<compile_context>
chip_gen: v7x
topology: tpu7x:2x2x1
jax: 0.10.0
libtpu: 0.0.40
codegen_flags: <defaults>
</compile_context>

<pallas_src>
import functools

import jax
import jax.numpy as jnp
from jax.experimental import pallas as pl
from jax.experimental.pallas import tpu as pltpu

# ----------------------------- small config -----------------------------
H = W = 32          # input image spatial size (stand-in for 224)
HW = H * W
C = 3               # RGB
A = 5               # num_fashion_attrs
D = 128             # embedding dim (stand-in for CLIP 1024)
D1 = 128            # encoder hidden dim
Q = 4               # resampler num_queries
OH = OW = 64        # output_height / output_width (stand-in for 512)
F = C * HW          # flattened per-attr feature size


def _vmem_spec(shape):
    """Whole-array VMEM block, grid=(1,)."""
    nd = len(shape)
    return pl.BlockSpec(shape, lambda i, _nd=nd: (0,) * _nd)


_SMEM_SPEC = pl.BlockSpec(memory_space=pltpu.MemorySpace.SMEM)
_ANY_SPEC = pl.BlockSpec(memory_space=pl.ANY)


# ----------------------------- the fused kernel -----------------------------
def _fused_kernel(tgt3_ref, sty_ref, segp_ref, wab_ref, w1_hbm, w2_ref, wproj_hbm,
                  sp_ref, rp_ref,
                  embeds_ref, mask_ref,
                  w1_vmem, wproj_vmem, dma_sems):
    # ---- kick off the two big weight DMAs; they overlap the VPU front-half ----
    cp_w1 = pltpu.make_async_copy(w1_hbm, w1_vmem, dma_sems.at[0])
    cp_w1.start()
    cp_wp = pltpu.make_async_copy(wproj_hbm, wproj_vmem, dma_sems.at[1])
    cp_wp.start()

    # ---- human segmentor on target -> 2-D human mask (H, W)  (VPU FMA, no MXU) ----
    bseg = segp_ref[C]                                              # SMEM scalar reads
    logit_t = bseg + segp_ref[0] * tgt3_ref[0]
    for c in range(1, C):
        logit_t = logit_t + segp_ref[c] * tgt3_ref[c]
    mask2d = jax.nn.sigmoid(logit_t)                                # (H, W)

    # ---- human segmentor on style -> masked human image (C, HW) ----
    sty = sty_ref[...]                                              # (C, HW)
    logit_s = bseg + segp_ref[0] * sty[0:1, :]
    for c in range(1, C):
        logit_s = logit_s + segp_ref[c] * sty[c:c + 1, :]
    himg = sty * jax.nn.sigmoid(logit_s)                            # (C, HW)

    # ---- fashion segmentor: attr logits + softmax (axis-0 reduce, A=5 in one tile) ----
    wab = wab_ref[...]                                              # (A, C+1) = [wattr | battr]
    logits = wab[:, C:C + 1] + wab[:, 0:1] * himg[0:1, :]
    for c in range(1, C):
        logits = logits + wab[:, c:c + 1] * himg[c:c + 1, :]        # (A, HW)
    m = jnp.max(logits, axis=0, keepdims=True)                      # single XLU reduce
    e = jnp.exp(logits - m)                                         # EUP
    s = jnp.sum(e, axis=0, keepdims=True)
    soft = e * pl.reciprocal(s, approx=True)                        # (A, HW)

    # ---- packed biases / affine params (static, 128-lane-aligned slices) ----
    b1 = sp_ref[0:1, 0:D1]
    b2 = sp_ref[0:1, D1:D1 + D]
    gamma = sp_ref[0:1, D1 + D:D1 + 2 * D]
    beta = sp_ref[0:1, D1 + 2 * D:D1 + 3 * D]
    bproj = sp_ref[1:2, :]

    # ---- image encoder: channel-wise accumulated bf16 MXU dots (no (A,F) concat) ----
    cp_w1.wait()
    acc = jnp.zeros((A, D1), jnp.float32)
    for c in range(C):
        xc = (soft * himg[c:c + 1, :]).astype(jnp.bfloat16)         # (A, HW)
        acc = acc + jnp.dot(xc, w1_vmem[c * HW:(c + 1) * HW, :],
                            preferred_element_type=jnp.float32)     # (A, D1)
    h = jax.nn.gelu(acc + b1)
    emb = jnp.dot(h.astype(jnp.bfloat16), w2_ref[...],
                  preferred_element_type=jnp.float32) + b2          # (A, D)

    # ---- token resampler: one (A,D)@(D,Q*D) bf16 matmul + per-query LayerNorm ----
    cp_wp.wait()
    y = jnp.dot(emb.astype(jnp.bfloat16), wproj_vmem[...],
                preferred_element_type=jnp.float32) + bproj         # (A, Q*D)
    for q in range(Q):                                              # lane-aligned direct stores
        yq = y[:, q * D:(q + 1) * D]
        mu = jnp.mean(yq, axis=-1, keepdims=True)
        var = jnp.mean(jnp.square(yq - mu), axis=-1, keepdims=True)
        embeds_ref[:, q * D:(q + 1) * D] = ((yq - mu) * jax.lax.rsqrt(var + 1e-5)
                                            * gamma + beta)

    # ---- bilinear mask resize via separable matmuls (packed resize matrices) ----
    ah = rp_ref[0:OH, 0:H]                                          # (OH, H)
    awt = rp_ref[OH:OH + W, :]                                      # (W, OW)
    tmp = jnp.dot(mask2d, awt, preferred_element_type=jnp.float32)  # (H, OW)
    mask_ref[...] = jnp.dot(ah, tmp, preferred_element_type=jnp.float32)  # (OH, OW)


def _fused_forward(params, target_img, sty_flat):
    return pl.pallas_call(
        _fused_kernel,
        grid=(1,),
        in_specs=[
            _vmem_spec((C, H, W)),        # target image (2-D spatial kept for the mask path)
            _vmem_spec((C, HW)),          # style image, flattened spatial
            _SMEM_SPEC,                   # segp = [wseg | bseg]  (scalar path)
            _vmem_spec((A, C + 1)),       # [wattr | battr]
            _ANY_SPEC,                    # w1 (bf16) — stays in HBM, manual DMA
            _vmem_spec((D1, D)),          # w2 (bf16)
            _ANY_SPEC,                    # wproj (bf16) — stays in HBM, manual DMA
            _vmem_spec((2, Q * D)),       # [b1|b2|gamma|beta ; bproj]
            _vmem_spec((OH + W, OW)),     # [ah|0 ; awt] bilinear-resize matrices
        ],
        out_specs=(_vmem_spec((A, Q * D)), _vmem_spec((OH, OW))),
        out_shape=(jax.ShapeDtypeStruct((A, Q * D), jnp.float32),
                   jax.ShapeDtypeStruct((OH, OW), jnp.float32)),
        scratch_shapes=[
            pltpu.VMEM((F, D1), jnp.bfloat16),       # w1 landing buffer
            pltpu.VMEM((D, Q * D), jnp.bfloat16),    # wproj landing buffer
            pltpu.SemaphoreType.DMA((2,)),
        ],
        compiler_params=pltpu.CompilerParams(dimension_semantics=("arbitrary",)),
    )(target_img, sty_flat, params["segp"], params["wab"],
      params["w1"], params["w2"], params["wproj"],
      params["small_pack"], params["resize_pack"])


# ------------------- bilinear resize matrices (align_corners=False) -------------------
def _bilinear_matrix(out_size, in_size):
    i = jnp.arange(out_size, dtype=jnp.float32)
    src = jnp.clip((i + 0.5) * (in_size / out_size) - 0.5, 0.0, in_size - 1.0)
    lo = jnp.floor(src).astype(jnp.int32)
    hi = jnp.minimum(lo + 1, in_size - 1)
    w_hi = src - lo.astype(jnp.float32)
    w_lo = 1.0 - w_hi
    m = (jax.nn.one_hot(lo, in_size, dtype=jnp.float32) * w_lo[:, None]
         + jax.nn.one_hot(hi, in_size, dtype=jnp.float32) * w_hi[:, None])
    return m


# ----------------------------- parameters -----------------------------
def init_params(key):
    ks = jax.random.split(key, 5)
    wseg = jax.random.normal(ks[0], (C,), jnp.float32) * 0.5
    bseg = jnp.zeros((1,), jnp.float32)
    wattr = jax.random.normal(ks[1], (A, C), jnp.float32) * 0.5
    battr = jnp.zeros((A, 1), jnp.float32)
    b1 = jnp.zeros((D1,), jnp.float32)
    b2 = jnp.zeros((D,), jnp.float32)
    gamma = jnp.ones((D,), jnp.float32)
    beta = jnp.zeros((D,), jnp.float32)
    bproj = jnp.zeros((Q * D,), jnp.float32)
    ah = _bilinear_matrix(OH, H)                       # (OH, H)
    awt = _bilinear_matrix(OW, W).T                    # (W, OW)
    ah_pad = jnp.pad(ah, ((0, 0), (0, OW - H)))        # (OH, OW), trailing zero cols
    return {
        # scalar-path segmentor params packed into one SMEM vector
        "segp": jnp.concatenate([wseg, bseg]),                          # (C+1,)
        # fashion-segmentor weight + bias packed along lanes
        "wab": jnp.concatenate([wattr, battr], axis=1),                 # (A, C+1)
        # encoder / resampler weights stored bf16 (MXU-native, halves the big DMAs)
        "w1": (jax.random.normal(ks[2], (F, D1), jnp.float32)
               / jnp.sqrt(float(F))).astype(jnp.bfloat16),
        "w2": (jax.random.normal(ks[3], (D1, D), jnp.float32)
               / jnp.sqrt(float(D1))).astype(jnp.bfloat16),
        "wproj": (jax.random.normal(ks[4], (D, Q * D), jnp.float32)
                  / jnp.sqrt(float(D))).astype(jnp.bfloat16),
        # all small f32 vectors packed into one (2, 512) array
        "small_pack": jnp.stack([jnp.concatenate([b1, b2, gamma, beta]), bproj]),
        # both bilinear-resize matrices packed into one (OH+W, OW) array
        "resize_pack": jnp.concatenate([ah_pad, awt], axis=0),
    }


# ----------------------------- forward -----------------------------
def local_style_projector(params, style_img, target_img):
    """style_img / target_img: (C, H, W) float32 in [0, 1]  (PyTorch CHW, batch==1).

    human_segmentor(target) -> human_mask ; human_segmentor(style) -> masked human image
    (matches the two separate segmentor calls of the original module).
    """
    # TODO(synk): original code emits a data-dependent number of fashion segments and
    # pads with torch.randint-resampled copies; the synthetic segmentor always emits
    # num_fashion_attrs, so that ragged branch is a structural no-op here.
    sty_flat = style_img.reshape(C, HW)
    embeds, human_mask = _fused_forward(params, target_img, sty_flat)
    # rearrange 'b n d -> (b n) d' : (A, Q*D) -> (A*Q, D) is a pure metadata reshape.
    return {"style_attr_embeds": embeds.reshape(A * Q, D), "human_mask": human_mask}


# ----------------------------- main -----------------------------
if __name__ == "__main__":
    key = jax.random.PRNGKey(0)
    k_style, k_target, k_params = jax.random.split(key, 3)
    params = init_params(k_params)

    style_img = jax.random.uniform(k_style, (C, H, W), dtype=jnp.float32)
    target_img = jax.random.uniform(k_target, (C, H, W), dtype=jnp.float32)

    fwd = jax.jit(functools.partial(local_style_projector, params))
    out = fwd(style_img, target_img)
    out = jax.block_until_ready(out)

    assert out["style_attr_embeds"].shape == (A * Q, D)
    assert out["human_mask"].shape == (OH, OW)
    assert bool(jnp.all(jnp.isfinite(out["style_attr_embeds"])))
    assert bool(jnp.all(jnp.isfinite(out["human_mask"])))
    print("KERNEL_OK")
</pallas_src>

<mosaic_0001>
module attributes {stable_mosaic.version = 11 : i64} {
  func.func @_fused_kernel(%arg0: i32, %arg1: memref<3x32x32xf32, #tpu.memory_space<vmem>>, %arg2: memref<3x1024xf32, #tpu.memory_space<vmem>>, %arg3: memref<4xf32, #tpu.memory_space<smem>>, %arg4: memref<5x4xf32, #tpu.memory_space<vmem>>, %arg5: memref<3072x128xbf16, #tpu.memory_space<any>>, %arg6: memref<128x128xbf16, #tpu.memory_space<vmem>>, %arg7: memref<128x512xbf16, #tpu.memory_space<any>>, %arg8: memref<2x512xf32, #tpu.memory_space<vmem>>, %arg9: memref<96x64xf32, #tpu.memory_space<vmem>>, %arg10: memref<5x512xf32, #tpu.memory_space<vmem>>, %arg11: memref<64x64xf32, #tpu.memory_space<vmem>>, %arg12: memref<3072x128xbf16, #tpu.memory_space<vmem>>, %arg13: memref<128x512xbf16, #tpu.memory_space<vmem>>, %arg14: memref<2x!tpu.dma_semaphore, #tpu.memory_space<semaphore_mem>>) attributes {dimension_semantics = [#tpu.dimension_semantics<arbitrary>], iteration_bounds = array<i64: 1>, scalar_prefetch = 0 : i64, scratch_operands = 3 : i64, tpu.core_type = #tpu.core_type<tc>, window_params = [{pipeline_mode = #tpu.pipeline_mode<synchronous>, transform_indices = @transform_0, window_bounds = array<i64: 3, 32, 32>}, {pipeline_mode = #tpu.pipeline_mode<synchronous>, transform_indices = @transform_1, window_bounds = array<i64: 3, 1024>}, {transform_indices = @transform_2, window_bounds = array<i64: 4>}, {pipeline_mode = #tpu.pipeline_mode<synchronous>, transform_indices = @transform_3, window_bounds = array<i64: 5, 4>}, {}, {pipeline_mode = #tpu.pipeline_mode<synchronous>, transform_indices = @transform_5, window_bounds = array<i64: 128, 128>}, {}, {pipeline_mode = #tpu.pipeline_mode<synchronous>, transform_indices = @transform_7, window_bounds = array<i64: 2, 512>}, {pipeline_mode = #tpu.pipeline_mode<synchronous>, transform_indices = @transform_8, window_bounds = array<i64: 96, 64>}, {pipeline_mode = #tpu.pipeline_mode<synchronous>, transform_indices = @transform_9, window_bounds = array<i64: 5, 512>}, {pipeline_mode = #tpu.pipeline_mode<synchronous>, transform_indices = @transform_10, window_bounds = array<i64: 64, 64>}]} {
    %c0_i32 = arith.constant 0 : i32
    %0 = tpu.memref_slice %arg14[%c0_i32] : memref<2x!tpu.dma_semaphore, #tpu.memory_space<semaphore_mem>> -> memref<1x!tpu.dma_semaphore, #tpu.memory_space<semaphore_mem>>
    %1 = tpu.memref_squeeze %0 : memref<1x!tpu.dma_semaphore, #tpu.memory_space<semaphore_mem>> -> memref<!tpu.dma_semaphore, #tpu.memory_space<semaphore_mem>>
    tpu.enqueue_dma source(%arg5 : memref<3072x128xbf16, #tpu.memory_space<any>>) target(%arg12 : memref<3072x128xbf16, #tpu.memory_space<vmem>>) target_semaphore(%1 : memref<!tpu.dma_semaphore, #tpu.memory_space<semaphore_mem>>)
    %c1_i32 = arith.constant 1 : i32
    %2 = tpu.memref_slice %arg14[%c1_i32] : memref<2x!tpu.dma_semaphore, #tpu.memory_space<semaphore_mem>> -> memref<1x!tpu.dma_semaphore, #tpu.memory_space<semaphore_mem>>
    %3 = tpu.memref_squeeze %2 : memref<1x!tpu.dma_semaphore, #tpu.memory_space<semaphore_mem>> -> memref<!tpu.dma_semaphore, #tpu.memory_space<semaphore_mem>>
    tpu.enqueue_dma source(%arg7 : memref<128x512xbf16, #tpu.memory_space<any>>) target(%arg13 : memref<128x512xbf16, #tpu.memory_space<vmem>>) target_semaphore(%3 : memref<!tpu.dma_semaphore, #tpu.memory_space<semaphore_mem>>)
    %c3 = arith.constant 3 : index
    %4 = memref.load %arg3[%c3] : memref<4xf32, #tpu.memory_space<smem>>
    %c0 = arith.constant 0 : index
    %5 = memref.load %arg3[%c0] : memref<4xf32, #tpu.memory_space<smem>>
    %c0_0 = arith.constant 0 : index
    %c0_1 = arith.constant 0 : index
    %c0_2 = arith.constant 0 : index
    %6 = vector.load %arg1[%c0_0, %c0_1, %c0_2] : memref<3x32x32xf32, #tpu.memory_space<vmem>>, vector<1x32x32xf32>
    %7 = vector.shape_cast %6 : vector<1x32x32xf32> to vector<32x32xf32>
    %8 = vector.broadcast %5 : f32 to vector<32x32xf32>
    %9 = arith.mulf %8, %7 : vector<32x32xf32>
    %10 = vector.broadcast %4 : f32 to vector<32x32xf32>
    %11 = arith.addf %10, %9 : vector<32x32xf32>
    %c1 = arith.constant 1 : index
    %12 = memref.load %arg3[%c1] : memref<4xf32, #tpu.memory_space<smem>>
    %c1_3 = arith.constant 1 : index
    %c0_4 = arith.constant 0 : index
    %c0_5 = arith.constant 0 : index
    %13 = vector.load %arg1[%c1_3, %c0_4, %c0_5] : memref<3x32x32xf32, #tpu.memory_space<vmem>>, vector<1x32x32xf32>
    %14 = vector.shape_cast %13 : vector<1x32x32xf32> to vector<32x32xf32>
    %15 = vector.broadcast %12 : f32 to vector<32x32xf32>
    %16 = arith.mulf %15, %14 : vector<32x32xf32>
    %17 = arith.addf %11, %16 : vector<32x32xf32>
    %c2 = arith.constant 2 : index
    %18 = memref.load %arg3[%c2] : memref<4xf32, #tpu.memory_space<smem>>
    %c2_6 = arith.constant 2 : index
    %c0_7 = arith.constant 0 : index
    %c0_8 = arith.constant 0 : index
    %19 = vector.load %arg1[%c2_6, %c0_7, %c0_8] : memref<3x32x32xf32, #tpu.memory_space<vmem>>, vector<1x32x32xf32>
    %20 = vector.shape_cast %19 : vector<1x32x32xf32> to vector<32x32xf32>
    %21 = vector.broadcast %18 : f32 to vector<32x32xf32>
    %22 = arith.mulf %21, %20 : vector<32x32xf32>
    %23 = arith.addf %17, %22 : vector<32x32xf32>
    %24 = arith.negf %23 : vector<32x32xf32>
    %25 = math.exp %24 : vector<32x32xf32>
    %cst = arith.constant 1.000000e+00 : f32
    %26 = vector.broadcast %cst : f32 to vector<32x32xf32>
    %27 = arith.addf %26, %25 : vector<32x32xf32>
    %28 = arith.divf %26, %27 : vector<32x32xf32>
    %c0_9 = arith.constant 0 : index
    %c0_10 = arith.constant 0 : index
    %29 = vector.load %arg2[%c0_9, %c0_10] : memref<3x1024xf32, #tpu.memory_space<vmem>>, vector<3x1024xf32>
    %c0_11 = arith.constant 0 : index
    %30 = memref.load %arg3[%c0_11] : memref<4xf32, #tpu.memory_space<smem>>
    %31 = vector.extract_strided_slice %29 {offsets = [0, 0], sizes = [1, 1024], strides = [1, 1]} : vector<3x1024xf32> to vector<1x1024xf32>
    %32 = vector.broadcast %30 : f32 to vector<1x1024xf32>
    %33 = arith.mulf %32, %31 : vector<1x1024xf32>
    %34 = vector.broadcast %4 : f32 to vector<1x1024xf32>
    %35 = arith.addf %34, %33 : vector<1x1024xf32>
    %c1_12 = arith.constant 1 : index
    %36 = memref.load %arg3[%c1_12] : memref<4xf32, #tpu.memory_space<smem>>
    %37 = vector.extract_strided_slice %29 {offsets = [1, 0], sizes = [1, 1024], strides = [1, 1]} : vector<3x1024xf32> to vector<1x1024xf32>
    %38 = vector.broadcast %36 : f32 to vector<1x1024xf32>
    %39 = arith.mulf %38, %37 : vector<1x1024xf32>
    %40 = arith.addf %35, %39 : vector<1x1024xf32>
    %c2_13 = arith.constant 2 : index
    %41 = memref.load %arg3[%c2_13] : memref<4xf32, #tpu.memory_space<smem>>
    %42 = vector.extract_strided_slice %29 {offsets = [2, 0], sizes = [1, 1024], strides = [1, 1]} : vector<3x1024xf32> to vector<1x1024xf32>
    %43 = vector.broadcast %41 : f32 to vector<1x1024xf32>
    %44 = arith.mulf %43, %42 : vector<1x1024xf32>
    %45 = arith.addf %40, %44 : vector<1x1024xf32>
    %46 = arith.negf %45 : vector<1x1024xf32>
    %47 = math.exp %46 : vector<1x1024xf32>
    %cst_14 = arith.constant 1.000000e+00 : f32
    %48 = vector.broadcast %cst_14 : f32 to vector<1x1024xf32>
    %49 = arith.addf %48, %47 : vector<1x1024xf32>
    %50 = arith.divf %48, %49 : vector<1x1024xf32>
    %51 = vector.broadcast %50 : vector<1x1024xf32> to vector<3x1024xf32>
    %52 = arith.mulf %29, %51 : vector<3x1024xf32>
    %c0_15 = arith.constant 0 : index
    %c0_16 = arith.constant 0 : index
    %53 = vector.load %arg4[%c0_15, %c0_16] : memref<5x4xf32, #tpu.memory_space<vmem>>, vector<5x4xf32>
    %54 = vector.extract_strided_slice %53 {offsets = [0, 3], sizes = [5, 1], strides = [1, 1]} : vector<5x4xf32> to vector<5x1xf32>
    %55 = vector.extract_strided_slice %53 {offsets = [0, 0], sizes = [5, 1], strides = [1, 1]} : vector<5x4xf32> to vector<5x1xf32>
    %56 = vector.extract_strided_slice %52 {offsets = [0, 0], sizes = [1, 1024], strides = [1, 1]} : vector<3x1024xf32> to vector<1x1024xf32>
    %57 = vector.broadcast %55 : vector<5x1xf32> to vector<5x1024xf32>
    %58 = vector.broadcast %56 : vector<1x1024xf32> to vector<5x1024xf32>
    %59 = arith.mulf %57, %58 : vector<5x1024xf32>
    %60 = vector.broadcast %54 : vector<5x1xf32> to vector<5x1024xf32>
    %61 = arith.addf %60, %59 : vector<5x1024xf32>
    %62 = vector.extract_strided_slice %53 {offsets = [0, 1], sizes = [5, 1], strides = [1, 1]} : vector<5x4xf32> to vector<5x1xf32>
    %63 = vector.extract_strided_slice %52 {offsets = [1, 0], sizes = [1, 1024], strides = [1, 1]} : vector<3x1024xf32> to vector<1x1024xf32>
    %64 = vector.broadcast %62 : vector<5x1xf32> to vector<5x1024xf32>
    %65 = vector.broadcast %63 : vector<1x1024xf32> to vector<5x1024xf32>
    %66 = arith.mulf %64, %65 : vector<5x1024xf32>
    %67 = arith.addf %61, %66 : vector<5x1024xf32>
    %68 = vector.extract_strided_slice %53 {offsets = [0, 2], sizes = [5, 1], strides = [1, 1]} : vector<5x4xf32> to vector<5x1xf32>
    %69 = vector.extract_strided_slice %52 {offsets = [2, 0], sizes = [1, 1024], strides = [1, 1]} : vector<3x1024xf32> to vector<1x1024xf32>
    %70 = vector.broadcast %68 : vector<5x1xf32> to vector<5x1024xf32>
    %71 = vector.broadcast %69 : vector<1x1024xf32> to vector<5x1024xf32>
    %72 = arith.mulf %70, %71 : vector<5x1024xf32>
    %73 = arith.addf %67, %72 : vector<5x1024xf32>
    %cst_17 = arith.constant dense<0xFF800000> : vector<1024xf32>
    %74 = vector.multi_reduction <maximumf>, %73, %cst_17 [0] : vector<5x1024xf32> to vector<1024xf32>
    %75 = vector.shape_cast %74 : vector<1024xf32> to vector<1x1024xf32>
    %76 = vector.broadcast %75 : vector<1x1024xf32> to vector<5x1024xf32>
    %77 = arith.subf %73, %76 : vector<5x1024xf32>
    %78 = math.exp %77 : vector<5x1024xf32>
    %cst_18 = arith.constant dense<0.000000e+00> : vector<1024xf32>
    %79 = vector.multi_reduction <add>, %78, %cst_18 [0] : vector<5x1024xf32> to vector<1024xf32>
    %80 = vector.shape_cast %79 : vector<1024xf32> to vector<1x1024xf32>
    %81 = tpu.reciprocal %80 {approx = true} : vector<1x1024xf32> -> vector<1x1024xf32>
    %82 = vector.broadcast %81 : vector<1x1024xf32> to vector<5x1024xf32>
    %83 = arith.mulf %78, %82 : vector<5x1024xf32>
    %c0_19 = arith.constant 0 : index
    %c0_20 = arith.constant 0 : index
    %84 = vector.load %arg8[%c0_19, %c0_20] : memref<2x512xf32, #tpu.memory_space<vmem>>, vector<1x128xf32>
    %c0_21 = arith.constant 0 : index
    %c128 = arith.constant 128 : index
    %85 = vector.load %arg8[%c0_21, %c128] : memref<2x512xf32, #tpu.memory_space<vmem>>, vector<1x128xf32>
    %c0_22 = arith.constant 0 : index
    %c256 = arith.constant 256 : index
    %86 = vector.load %arg8[%c0_22, %c256] : memref<2x512xf32, #tpu.memory_space<vmem>>, vector<1x128xf32>
    %c0_23 = arith.constant 0 : index
    %c384 = arith.constant 384 : index
    %87 = vector.load %arg8[%c0_23, %c384] : memref<2x512xf32, #tpu.memory_space<vmem>>, vector<1x128xf32>
    %c1_24 = arith.constant 1 : index
    %c0_25 = arith.constant 0 : index
    %88 = vector.load %arg8[%c1_24, %c0_25] : memref<2x512xf32, #tpu.memory_space<vmem>>, vector<1x512xf32>
    %c0_i32_26 = arith.constant 0 : i32
    %89 = tpu.memref_slice %arg14[%c0_i32_26] : memref<2x!tpu.dma_semaphore, #tpu.memory_space<semaphore_mem>> -> memref<1x!tpu.dma_semaphore, #tpu.memory_space<semaphore_mem>>
    %90 = tpu.memref_squeeze %89 : memref<1x!tpu.dma_semaphore, #tpu.memory_space<semaphore_mem>> -> memref<!tpu.dma_semaphore, #tpu.memory_space<semaphore_mem>>
    tpu.wait_dma2 semaphore(%90 : memref<!tpu.dma_semaphore, #tpu.memory_space<semaphore_mem>>) src(%arg5 : memref<3072x128xbf16, #tpu.memory_space<any>>) dst(%arg12 : memref<3072x128xbf16, #tpu.memory_space<vmem>>)
    %cst_27 = arith.constant 0.000000e+00 : f32
    %91 = vector.broadcast %cst_27 : f32 to vector<5x128xf32>
    %92 = vector.extract_strided_slice %52 {offsets = [0, 0], sizes = [1, 1024], strides = [1, 1]} : vector<3x1024xf32> to vector<1x1024xf32>
    %93 = vector.broadcast %92 : vector<1x1024xf32> to vector<5x1024xf32>
    %94 = arith.mulf %83, %93 : vector<5x1024xf32>
    %95 = arith.truncf %94 : vector<5x1024xf32> to vector<5x1024xbf16>
    %c0_28 = arith.constant 0 : index
    %c0_29 = arith.constant 0 : index
    %96 = vector.load %arg12[%c0_28, %c0_29] : memref<3072x128xbf16, #tpu.memory_space<vmem>>, vector<1024x128xbf16>
    %cst_30 = arith.constant dense<0.000000e+00> : vector<5x128xf32>
    %97 = tpu.matmul %95, %96, %cst_30 {dimension_numbers = #tpu.dot_dimension_numbers<[1], [0], [0], [1], [0, 0, 1, 1], [], []>} : vector<5x1024xbf16>, vector<1024x128xbf16>, vector<5x128xf32> -> vector<5x128xf32>
    %98 = arith.addf %91, %97 : vector<5x128xf32>
    %99 = vector.extract_strided_slice %52 {offsets = [1, 0], sizes = [1, 1024], strides = [1, 1]} : vector<3x1024xf32> to vector<1x1024xf32>
    %100 = vector.broadcast %99 : vector<1x1024xf32> to vector<5x1024xf32>
    %101 = arith.mulf %83, %100 : vector<5x1024xf32>
    %102 = arith.truncf %101 : vector<5x1024xf32> to vector<5x1024xbf16>
    %c1024 = arith.constant 1024 : index
    %c0_31 = arith.constant 0 : index
    %103 = vector.load %arg12[%c1024, %c0_31] : memref<3072x128xbf16, #tpu.memory_space<vmem>>, vector<1024x128xbf16>
    %cst_32 = arith.constant dense<0.000000e+00> : vector<5x128xf32>
    %104 = tpu.matmul %102, %103, %cst_32 {dimension_numbers = #tpu.dot_dimension_numbers<[1], [0], [0], [1], [0, 0, 1, 1], [], []>} : vector<5x1024xbf16>, vector<1024x128xbf16>, vector<5x128xf32> -> vector<5x128xf32>
    %105 = arith.addf %98, %104 : vector<5x128xf32>
    %106 = vector.extract_strided_slice %52 {offsets = [2, 0], sizes = [1, 1024], strides = [1, 1]} : vector<3x1024xf32> to vector<1x1024xf32>
    %107 = vector.broadcast %106 : vector<1x1024xf32> to vector<5x1024xf32>
    %108 = arith.mulf %83, %107 : vector<5x1024xf32>
    %109 = arith.truncf %108 : vector<5x1024xf32> to vector<5x1024xbf16>
    %c2048 = arith.constant 2048 : index
    %c0_33 = arith.constant 0 : index
    %110 = vector.load %arg12[%c2048, %c0_33] : memref<3072x128xbf16, #tpu.memory_space<vmem>>, vector<1024x128xbf16>
    %cst_34 = arith.constant dense<0.000000e+00> : vector<5x128xf32>
    %111 = tpu.matmul %109, %110, %cst_34 {dimension_numbers = #tpu.dot_dimension_numbers<[1], [0], [0], [1], [0, 0, 1, 1], [], []>} : vector<5x1024xbf16>, vector<1024x128xbf16>, vector<5x128xf32> -> vector<5x128xf32>
    %112 = arith.addf %105, %111 : vector<5x128xf32>
    %113 = vector.broadcast %84 : vector<1x128xf32> to vector<5x128xf32>
    %114 = arith.addf %112, %113 : vector<5x128xf32>
    %115 = arith.mulf %114, %114 : vector<5x128xf32>
    %116 = arith.mulf %114, %115 : vector<5x128xf32>
    %cst_35 = arith.constant 4.471500e-02 : f32
    %117 = vector.broadcast %cst_35 : f32 to vector<5x128xf32>
    %118 = arith.mulf %117, %116 : vector<5x128xf32>
    %119 = arith.addf %114, %118 : vector<5x128xf32>
    %cst_36 = arith.constant 0.797884583 : f32
    %120 = vector.broadcast %cst_36 : f32 to vector<5x128xf32>
    %121 = arith.mulf %120, %119 : vector<5x128xf32>
    %122 = math.tanh %121 : vector<5x128xf32>
    %cst_37 = arith.constant 1.000000e+00 : f32
    %123 = vector.broadcast %cst_37 : f32 to vector<5x128xf32>
    %124 = arith.addf %123, %122 : vector<5x128xf32>
    %cst_38 = arith.constant 5.000000e-01 : f32
    %125 = vector.broadcast %cst_38 : f32 to vector<5x128xf32>
    %126 = arith.mulf %125, %124 : vector<5x128xf32>
    %127 = arith.mulf %114, %126 : vector<5x128xf32>
    %128 = arith.truncf %127 : vector<5x128xf32> to vector<5x128xbf16>
    %c0_39 = arith.constant 0 : index
    %c0_40 = arith.constant 0 : index
    %129 = vector.load %arg6[%c0_39, %c0_40] : memref<128x128xbf16, #tpu.memory_space<vmem>>, vector<128x128xbf16>
    %cst_41 = arith.constant dense<0.000000e+00> : vector<5x128xf32>
    %130 = tpu.matmul %128, %129, %cst_41 {dimension_numbers = #tpu.dot_dimension_numbers<[1], [0], [0], [1], [0, 0, 1, 1], [], []>} : vector<5x128xbf16>, vector<128x128xbf16>, vector<5x128xf32> -> vector<5x128xf32>
    %131 = vector.broadcast %85 : vector<1x128xf32> to vector<5x128xf32>
    %132 = arith.addf %130, %131 : vector<5x128xf32>
    %c1_i32_42 = arith.constant 1 : i32
    %133 = tpu.memref_slice %arg14[%c1_i32_42] : memref<2x!tpu.dma_semaphore, #tpu.memory_space<semaphore_mem>> -> memref<1x!tpu.dma_semaphore, #tpu.memory_space<semaphore_mem>>
    %134 = tpu.memref_squeeze %133 : memref<1x!tpu.dma_semaphore, #tpu.memory_space<semaphore_mem>> -> memref<!tpu.dma_semaphore, #tpu.memory_space<semaphore_mem>>
    tpu.wait_dma2 semaphore(%134 : memref<!tpu.dma_semaphore, #tpu.memory_space<semaphore_mem>>) src(%arg7 : memref<128x512xbf16, #tpu.memory_space<any>>) dst(%arg13 : memref<128x512xbf16, #tpu.memory_space<vmem>>)
    %135 = arith.truncf %132 : vector<5x128xf32> to vector<5x128xbf16>
    %c0_43 = arith.constant 0 : index
    %c0_44 = arith.constant 0 : index
    %136 = vector.load %arg13[%c0_43, %c0_44] : memref<128x512xbf16, #tpu.memory_space<vmem>>, vector<128x512xbf16>
    %cst_45 = arith.constant dense<0.000000e+00> : vector<5x512xf32>
    %137 = tpu.matmul %135, %136, %cst_45 {dimension_numbers = #tpu.dot_dimension_numbers<[1], [0], [0], [1], [0, 0, 1, 1], [], []>} : vector<5x128xbf16>, vector<128x512xbf16>, vector<5x512xf32> -> vector<5x512xf32>
    %138 = vector.broadcast %88 : vector<1x512xf32> to vector<5x512xf32>
    %139 = arith.addf %137, %138 : vector<5x512xf32>
    %140 = vector.extract_strided_slice %139 {offsets = [0, 0], sizes = [5, 128], strides = [1, 1]} : vector<5x512xf32> to vector<5x128xf32>
    %cst_46 = arith.constant dense<0.000000e+00> : vector<5xf32>
    %141 = vector.multi_reduction <add>, %140, %cst_46 [1] : vector<5x128xf32> to vector<5xf32>
    %142 = vector.shape_cast %141 : vector<5xf32> to vector<5x1xf32>
    %cst_47 = arith.constant 1.280000e+02 : f32
    %143 = vector.broadcast %cst_47 : f32 to vector<5x1xf32>
    %144 = arith.divf %142, %143 : vector<5x1xf32>
    %145 = vector.broadcast %144 : vector<5x1xf32> to vector<5x128xf32>
    %146 = arith.subf %140, %145 : vector<5x128xf32>
    %147 = arith.mulf %146, %146 : vector<5x128xf32>
    %cst_48 = arith.constant dense<0.000000e+00> : vector<5xf32>
    %148 = vector.multi_reduction <add>, %147, %cst_48 [1] : vector<5x128xf32> to vector<5xf32>
    %149 = vector.shape_cast %148 : vector<5xf32> to vector<5x1xf32>
    %cst_49 = arith.constant 1.280000e+02 : f32
    %150 = vector.broadcast %cst_49 : f32 to vector<5x1xf32>
    %151 = arith.divf %149, %150 : vector<5x1xf32>
    %152 = vector.broadcast %144 : vector<5x1xf32> to vector<5x128xf32>
    %153 = arith.subf %140, %152 : vector<5x128xf32>
    %cst_50 = arith.constant 9.99999974E-6 : f32
    %154 = vector.broadcast %cst_50 : f32 to vector<5x1xf32>
    %155 = arith.addf %151, %154 : vector<5x1xf32>
    %156 = math.rsqrt %155 : vector<5x1xf32>
    %157 = vector.broadcast %156 : vector<5x1xf32> to vector<5x128xf32>
    %158 = arith.mulf %153, %157 : vector<5x128xf32>
    %159 = vector.broadcast %86 : vector<1x128xf32> to vector<5x128xf32>
    %160 = arith.mulf %158, %159 : vector<5x128xf32>
    %161 = vector.broadcast %87 : vector<1x128xf32> to vector<5x128xf32>
    %162 = arith.addf %160, %161 : vector<5x128xf32>
    %c0_51 = arith.constant 0 : index
    %c0_52 = arith.constant 0 : index
    %163 = vector.load %arg10[%c0_51, %c0_52] : memref<5x512xf32, #tpu.memory_space<vmem>>, vector<5x128xf32>
    tpu.vector_store %arg10[%c0_51, %c0_52], %162 {strides = array<i32>} : memref<5x512xf32, #tpu.memory_space<vmem>>, vector<5x128xf32>,
    %164 = vector.extract_strided_slice %139 {offsets = [0, 128], sizes = [5, 128], strides = [1, 1]} : vector<5x512xf32> to vector<5x128xf32>
    %cst_53 = arith.constant dense<0.000000e+00> : vector<5xf32>
    %165 = vector.multi_reduction <add>, %164, %cst_53 [1] : vector<5x128xf32> to vector<5xf32>
    %166 = vector.shape_cast %165 : vector<5xf32> to vector<5x1xf32>
    %cst_54 = arith.constant 1.280000e+02 : f32
    %167 = vector.broadcast %cst_54 : f32 to vector<5x1xf32>
    %168 = arith.divf %166, %167 : vector<5x1xf32>
    %169 = vector.broadcast %168 : vector<5x1xf32> to vector<5x128xf32>
    %170 = arith.subf %164, %169 : vector<5x128xf32>
    %171 = arith.mulf %170, %170 : vector<5x128xf32>
    %cst_55 = arith.constant dense<0.000000e+00> : vector<5xf32>
    %172 = vector.multi_reduction <add>, %171, %cst_55 [1] : vector<5x128xf32> to vector<5xf32>
    %173 = vector.shape_cast %172 : vector<5xf32> to vector<5x1xf32>
    %cst_56 = arith.constant 1.280000e+02 : f32
    %174 = vector.broadcast %cst_56 : f32 to vector<5x1xf32>
    %175 = arith.divf %173, %174 : vector<5x1xf32>
    %176 = vector.broadcast %168 : vector<5x1xf32> to vector<5x128xf32>
    %177 = arith.subf %164, %176 : vector<5x128xf32>
    %cst_57 = arith.constant 9.99999974E-6 : f32
    %178 = vector.broadcast %cst_57 : f32 to vector<5x1xf32>
    %179 = arith.addf %175, %178 : vector<5x1xf32>
    %180 = math.rsqrt %179 : vector<5x1xf32>
    %181 = vector.broadcast %180 : vector<5x1xf32> to vector<5x128xf32>
    %182 = arith.mulf %177, %181 : vector<5x128xf32>
    %183 = vector.broadcast %86 : vector<1x128xf32> to vector<5x128xf32>
    %184 = arith.mulf %182, %183 : vector<5x128xf32>
    %185 = vector.broadcast %87 : vector<1x128xf32> to vector<5x128xf32>
    %186 = arith.addf %184, %185 : vector<5x128xf32>
    %c0_58 = arith.constant 0 : index
    %c128_59 = arith.constant 128 : index
    %187 = vector.load %arg10[%c0_58, %c128_59] : memref<5x512xf32, #tpu.memory_space<vmem>>, vector<5x128xf32>
    tpu.vector_store %arg10[%c0_58, %c128_59], %186 {strides = array<i32>} : memref<5x512xf32, #tpu.memory_space<vmem>>, vector<5x128xf32>,
    %188 = vector.extract_strided_slice %139 {offsets = [0, 256], sizes = [5, 128], strides = [1, 1]} : vector<5x512xf32> to vector<5x128xf32>
    %cst_60 = arith.constant dense<0.000000e+00> : vector<5xf32>
    %189 = vector.multi_reduction <add>, %188, %cst_60 [1] : vector<5x128xf32> to vector<5xf32>
    %190 = vector.shape_cast %189 : vector<5xf32> to vector<5x1xf32>
    %cst_61 = arith.constant 1.280000e+02 : f32
    %191 = vector.broadcast %cst_61 : f32 to vector<5x1xf32>
    %192 = arith.divf %190, %191 : vector<5x1xf32>
    %193 = vector.broadcast %192 : vector<5x1xf32> to vector<5x128xf32>
    %194 = arith.subf %188, %193 : vector<5x128xf32>
    %195 = arith.mulf %194, %194 : vector<5x128xf32>
    %cst_62 = arith.constant dense<0.000000e+00> : vector<5xf32>
    %196 = vector.multi_reduction <add>, %195, %cst_62 [1] : vector<5x128xf32> to vector<5xf32>
    %197 = vector.shape_cast %196 : vector<5xf32> to vector<5x1xf32>
    %cst_63 = arith.constant 1.280000e+02 : f32
    %198 = vector.broadcast %cst_63 : f32 to vector<5x1xf32>
    %199 = arith.divf %197, %198 : vector<5x1xf32>
    %200 = vector.broadcast %192 : vector<5x1xf32> to vector<5x128xf32>
    %201 = arith.subf %188, %200 : vector<5x128xf32>
    %cst_64 = arith.constant 9.99999974E-6 : f32
    %202 = vector.broadcast %cst_64 : f32 to vector<5x1xf32>
    %203 = arith.addf %199, %202 : vector<5x1xf32>
    %204 = math.rsqrt %203 : vector<5x1xf32>
    %205 = vector.broadcast %204 : vector<5x1xf32> to vector<5x128xf32>
    %206 = arith.mulf %201, %205 : vector<5x128xf32>
    %207 = vector.broadcast %86 : vector<1x128xf32> to vector<5x128xf32>
    %208 = arith.mulf %206, %207 : vector<5x128xf32>
    %209 = vector.broadcast %87 : vector<1x128xf32> to vector<5x128xf32>
    %210 = arith.addf %208, %209 : vector<5x128xf32>
    %c0_65 = arith.constant 0 : index
    %c256_66 = arith.constant 256 : index
    %211 = vector.load %arg10[%c0_65, %c256_66] : memref<5x512xf32, #tpu.memory_space<vmem>>, vector<5x128xf32>
    tpu.vector_store %arg10[%c0_65, %c256_66], %210 {strides = array<i32>} : memref<5x512xf32, #tpu.memory_space<vmem>>, vector<5x128xf32>,
    %212 = vector.extract_strided_slice %139 {offsets = [0, 384], sizes = [5, 128], strides = [1, 1]} : vector<5x512xf32> to vector<5x128xf32>
    %cst_67 = arith.constant dense<0.000000e+00> : vector<5xf32>
    %213 = vector.multi_reduction <add>, %212, %cst_67 [1] : vector<5x128xf32> to vector<5xf32>
    %214 = vector.shape_cast %213 : vector<5xf32> to vector<5x1xf32>
    %cst_68 = arith.constant 1.280000e+02 : f32
    %215 = vector.broadcast %cst_68 : f32 to vector<5x1xf32>
    %216 = arith.divf %214, %215 : vector<5x1xf32>
    %217 = vector.broadcast %216 : vector<5x1xf32> to vector<5x128xf32>
    %218 = arith.subf %212, %217 : vector<5x128xf32>
    %219 = arith.mulf %218, %218 : vector<5x128xf32>
    %cst_69 = arith.constant dense<0.000000e+00> : vector<5xf32>
    %220 = vector.multi_reduction <add>, %219, %cst_69 [1] : vector<5x128xf32> to vector<5xf32>
    %221 = vector.shape_cast %220 : vector<5xf32> to vector<5x1xf32>
    %cst_70 = arith.constant 1.280000e+02 : f32
    %222 = vector.broadcast %cst_70 : f32 to vector<5x1xf32>
    %223 = arith.divf %221, %222 : vector<5x1xf32>
    %224 = vector.broadcast %216 : vector<5x1xf32> to vector<5x128xf32>
    %225 = arith.subf %212, %224 : vector<5x128xf32>
    %cst_71 = arith.constant 9.99999974E-6 : f32
    %226 = vector.broadcast %cst_71 : f32 to vector<5x1xf32>
    %227 = arith.addf %223, %226 : vector<5x1xf32>
    %228 = math.rsqrt %227 : vector<5x1xf32>
    %229 = vector.broadcast %228 : vector<5x1xf32> to vector<5x128xf32>
    %230 = arith.mulf %225, %229 : vector<5x128xf32>
    %231 = vector.broadcast %86 : vector<1x128xf32> to vector<5x128xf32>
    %232 = arith.mulf %230, %231 : vector<5x128xf32>
    %233 = vector.broadcast %87 : vector<1x128xf32> to vector<5x128xf32>
    %234 = arith.addf %232, %233 : vector<5x128xf32>
    %c0_72 = arith.constant 0 : index
    %c384_73 = arith.constant 384 : index
    %235 = vector.load %arg10[%c0_72, %c384_73] : memref<5x512xf32, #tpu.memory_space<vmem>>, vector<5x128xf32>
    tpu.vector_store %arg10[%c0_72, %c384_73], %234 {strides = array<i32>} : memref<5x512xf32, #tpu.memory_space<vmem>>, vector<5x128xf32>,
    %c0_74 = arith.constant 0 : index
    %c0_75 = arith.constant 0 : index
    %236 = vector.load %arg9[%c0_74, %c0_75] : memref<96x64xf32, #tpu.memory_space<vmem>>, vector<64x32xf32>
    %c64 = arith.constant 64 : index
    %c0_76 = arith.constant 0 : index
    %237 = vector.load %arg9[%c64, %c0_76] : memref<96x64xf32, #tpu.memory_space<vmem>>, vector<32x64xf32>
    %cst_77 = arith.constant dense<0.000000e+00> : vector<32x64xf32>
    %238 = tpu.matmul %28, %237, %cst_77 {dimension_numbers = #tpu.dot_dimension_numbers<[1], [0], [0], [1], [0, 0, 1, 1], [], []>} : vector<32x32xf32>, vector<32x64xf32>, vector<32x64xf32> -> vector<32x64xf32>
    %cst_78 = arith.constant dense<0.000000e+00> : vector<64x64xf32>
    %239 = tpu.matmul %236, %238, %cst_78 {dimension_numbers = #tpu.dot_dimension_numbers<[1], [0], [0], [1], [0, 0, 1, 1], [], []>} : vector<64x32xf32>, vector<32x64xf32>, vector<64x64xf32> -> vector<64x64xf32>
    %c0_79 = arith.constant 0 : index
    %c0_80 = arith.constant 0 : index
    %240 = vector.load %arg11[%c0_79, %c0_80] : memref<64x64xf32, #tpu.memory_space<vmem>>, vector<64x64xf32>
    tpu.vector_store %arg11[%c0_79, %c0_80], %239 {strides = array<i32>} : memref<64x64xf32, #tpu.memory_space<vmem>>, vector<64x64xf32>,
    return
  }
  func.func @transform_0(%arg0: i32) -> (i32, i32, i32) {
    %c0_i32 = arith.constant 0 : i32
    %c0_i32_0 = arith.constant 0 : i32
    %c0_i32_1 = arith.constant 0 : i32
    %c0_i32_2 = arith.constant 0 : i32
    return %c0_i32, %c0_i32_0, %c0_i32_1 : i32, i32, i32
  }
  func.func @transform_1(%arg0: i32) -> (i32, i32) {
    %c0_i32 = arith.constant 0 : i32
    %c0_i32_0 = arith.constant 0 : i32
    %c0_i32_1 = arith.constant 0 : i32
    return %c0_i32, %c0_i32_0 : i32, i32
  }
  func.func @transform_2(%arg0: i32) -> i32 {
    %c0_i32 = arith.constant 0 : i32
    %c0_i32_0 = arith.constant 0 : i32
    return %c0_i32 : i32
  }
  func.func @transform_3(%arg0: i32) -> (i32, i32) {
    %c0_i32 = arith.constant 0 : i32
    %c0_i32_0 = arith.constant 0 : i32
    %c0_i32_1 = arith.constant 0 : i32
    return %c0_i32, %c0_i32_0 : i32, i32
  }
  func.func @transform_5(%arg0: i32) -> (i32, i32) {
    %c0_i32 = arith.constant 0 : i32
    %c0_i32_0 = arith.constant 0 : i32
    %c0_i32_1 = arith.constant 0 : i32
    return %c0_i32, %c0_i32_0 : i32, i32
  }
  func.func @transform_7(%arg0: i32) -> (i32, i32) {
    %c0_i32 = arith.constant 0 : i32
    %c0_i32_0 = arith.constant 0 : i32
    %c0_i32_1 = arith.constant 0 : i32
    return %c0_i32, %c0_i32_0 : i32, i32
  }
  func.func @transform_8(%arg0: i32) -> (i32, i32) {
    %c0_i32 = arith.constant 0 : i32
    %c0_i32_0 = arith.constant 0 : i32
    %c0_i32_1 = arith.constant 0 : i32
    return %c0_i32, %c0_i32_0 : i32, i32
  }
  func.func @transform_9(%arg0: i32) -> (i32, i32) {
    %c0_i32 = arith.constant 0 : i32
    %c0_i32_0 = arith.constant 0 : i32
    %c0_i32_1 = arith.constant 0 : i32
    return %c0_i32, %c0_i32_0 : i32, i32
  }
  func.func @transform_10(%arg0: i32) -> (i32, i32) {
    %c0_i32 = arith.constant 0 : i32
    %c0_i32_0 = arith.constant 0 : i32
    %c0_i32_1 = arith.constant 0 : i32
    return %c0_i32, %c0_i32_0 : i32, i32
  }
}

</mosaic_0001>

<bundles_post_ra>
// kernel: local_style_projector.1
= control target key start
LH: loop header
LB: loop body
LE: loop exit
PB: predicated region body
PF: predicated region fallthrough
CT: control target
= control target key end

     0   :  { %16 = vsyncpa [#allocation7], 0  ;;  %s3814_s0 = inlined_call_operand.vmem [shape: f32[3,32,32], index: 0, kind: input, shape index: {}]   ;;  %s3815_s1 = inlined_call_operand.vmem [shape: f32[3,1024], index: 1, kind: input, shape index: {}]   ;;  %s3816_s2 = inlined_call_operand.vmem [shape: f32[4], index: 2, kind: input, shape index: {}]   ;;  %s3817_s3 = inlined_call_operand.vmem [shape: f32[5,4], index: 3, kind: input, shape index: {}]   ;;  %s3818_s4 = inlined_call_operand.hbm [shape: bf16[3072,128], index: 4, kind: input, shape index: {}]   ;;  %s3819_s5 = inlined_call_operand.vmem [shape: bf16[128,128], index: 5, kind: input, shape index: {}]   ;;  %s3820_s6 = inlined_call_operand.vmem [shape: bf16[128,512], index: 6, kind: input, shape index: {}]   ;;  %s3821_s7 = inlined_call_operand.vmem [shape: f32[2,512], index: 7, kind: input, shape index: {}]   ;;  %s3822_s8 = inlined_call_operand.vmem [shape: f32[96,64], index: 8, kind: input, shape index: {}]   ;;  %s3823_s9 = inlined_call_operand.vmem [shape: f32[5,512], index: 9, kind: output, shape index: {0}]   ;;  %s3824_s10 = inlined_call_operand.hbm [shape: f32[64,64], index: 10, kind: output, shape index: {1}]  }
   0x1   :  { %17 = vsyncpa [#allocation6], 0  ;;  %s28_s15 = sshll.u32 %s3816_s2, 4  ;;  %s29_s15 = int_to_ptr.vmem [resolvable:$true] %s28_s15 }
   0x2   :  { %s2928_s16 = scalar_lea.vmem %s29_s15, 16  ;;  %p2933_p1 = scmp.lt.s32.totalorder %s29_s15, %s29_s15 }
   0x3   :  { %p2929_p0 = scmp.ne.s32.totalorder %s29_s15, %s2928_s16  ;;  %p2934_p2 = scmp.lt.s32.totalorder %s2928_s16, %s2928_s16 }
   0x5   :  { %p2935_p3 = por %p2934_p2, %p2933_p1 }
   0x7   :  { %p2936_p4 = pnand %p2935_p3, %p2929_p0 }
   0x9   :  { %2939 = shalt.err (!%p2936_p4)
}
   0xa   :  { %s2992_s17 = smov [#allocation5]  }
   0xb   :  { %31 = dma.vmem_to_smem %s29_s15, 16, %s2992_s17, [#allocation7]  }
   0xc   :  { %2984 = dma.done.wait [#allocation7], 16  }
   0xd   :  { %2985 = vsyncadd [#allocation7], 4294967280 }
   0xe   :  { %43 = sfence }
   0xf   :  { %v74_v0 = vld [vmem:[%s3820_s6] sm:$0xf]  ;;  %v76_v1 = vld [vmem:[%s3820_s6 + $0x10] sm:$0xf]  ;;  %s2993_s23 = smov [#allocation2]   ;;  %s2940_s19 = scalar_lea.hbm %s3818_s4, 24576 }
  0x10   :  { %v88_v2 = vld [vmem:[%s3820_s6 + $0x1c] sm:$0xff]   ;;  %s52_s24 = sshll.u32 %s2993_s23, 4  ;;  %75 = vst [vmem:[#allocation3] sm:$0xf] %v74_v0  ;;  %77 = vst [vmem:[#allocation3 + $0x4] sm:$0xf] %v76_v1  ;;  %p2941_p5 = scmp.ne.s32.totalorder %s3818_s4, %s2940_s19  ;;  %s53_s24 = int_to_ptr.vmem [resolvable:$true] %s52_s24 }
  0x11   :  { %v78_v3 = vld [vmem:[%s3820_s6 + $0x4] sm:$0xf]  ;;  %v80_v4 = vld [vmem:[%s3820_s6 + $0x14] sm:$0xf]  ;;  %89 = vst [vmem:[#allocation3 + $0x1c] sm:$0xff] %v88_v2   ;;  %v104_v5 = vld [vmem:[%s3820_s6 + $0x3c] sm:$0xff]   ;;  %p2944_p6 = scmp.lt.u32.totalorder %s2940_s19, %s3818_s4 }
  0x12   :  { %79 = vst [vmem:[#allocation3 + $0x8] sm:$0xf] %v78_v3  ;;  %81 = vst [vmem:[#allocation3 + $0xc] sm:$0xf] %v80_v4  ;;  %v82_v6 = vld [vmem:[%s3820_s6 + $0x8] sm:$0xf] }
  0x13   :  { %v84_v7 = vld [vmem:[%s3820_s6 + $0x18] sm:$0xf]  ;;  %v86_v8 = vld [vmem:[%s3820_s6 + $0xc] sm:$0xf]  ;;  %105 = vst [vmem:[#allocation3 + $0x3c] sm:$0xff] %v104_v5   ;;  %p2946_p7 = pnand %p2944_p6, %p2941_p5 }
  0x15   :  { %2949 = shalt.err (!%p2946_p7)  }
  0x16   :  { %s2950_s23 = scalar_lea.vmem %s53_s24, 24576  ;;  %p2955_p9 = scmp.lt.s32.totalorder %s53_s24, %s53_s24 }
  0x17   :  { %p2951_p8 = scmp.ne.s32.totalorder %s53_s24, %s2950_s23  ;;  %p2956_p10 = scmp.lt.s32.totalorder %s2950_s23, %s2950_s23 }
  0x19   :  { %p2957_p11 = por %p2956_p10, %p2955_p9 }
  0x1b   :  { %p2958_p12 = pnand %p2957_p11, %p2951_p8 }
  0x1d   :  { %2961 = shalt.err (!%p2958_p12)  }
  0x1e   :  { %55 = dma.hbm_to_vmem [thread:$0]  %s3818_s4, 24576, %s53_s24, [#allocation4]  ;;  %83 = vst [vmem:[#allocation3 + $0x10] sm:$0xf] %v82_v6  ;;  %85 = vst [vmem:[#allocation3 + $0x14] sm:$0xf] %v84_v7 }
  0x1f   :  { %87 = vst [vmem:[#allocation3 + $0x18] sm:$0xf] %v86_v8  ;;  %v92_v9 = vld [vmem:[%s3820_s6 + $0x30] sm:$0xf]  ;;  %v94_v10 = vld [vmem:[%s3820_s6 + $0x24] sm:$0xf] }
  0x20   :  { %93 = vst [vmem:[#allocation3 + $0x24] sm:$0xf] %v92_v9  ;;  %95 = vst [vmem:[#allocation3 + $0x28] sm:$0xf] %v94_v10  ;;  %v96_v11 = vld [vmem:[%s3820_s6 + $0x34] sm:$0xf] }
  0x21   :  { %v98_v12 = vld [vmem:[%s3820_s6 + $0x28] sm:$0xf]  ;;  %v100_v13 = vld [vmem:[%s3820_s6 + $0x38] sm:$0xf]  ;;  %97 = vst [vmem:[#allocation3 + $0x2c] sm:$0xf] %v96_v11 }
  0x22   :  { %99 = vst [vmem:[#allocation3 + $0x30] sm:$0xf] %v98_v12  ;;  %101 = vst [vmem:[#allocation3 + $0x34] sm:$0xf] %v100_v13  ;;  %v102_v14 = vld [vmem:[%s3820_s6 + $0x2c] sm:$0xf] }
  0x23   :  { %v108_v15 = vld [vmem:[%s3820_s6 + $0x50] sm:$0xf]  ;;  %v110_v16 = vld [vmem:[%s3820_s6 + $0x44] sm:$0xf]  ;;  %103 = vst [vmem:[#allocation3 + $0x38] sm:$0xf] %v102_v14 }
  0x24   :  { %109 = vst [vmem:[#allocation3 + $0x44] sm:$0xf] %v108_v15  ;;  %111 = vst [vmem:[#allocation3 + $0x48] sm:$0xf] %v110_v16  ;;  %v112_v17 = vld [vmem:[%s3820_s6 + $0x54] sm:$0xf] }
  0x25   :  { %v114_v18 = vld [vmem:[%s3820_s6 + $0x48] sm:$0xf]  ;;  %v116_v19 = vld [vmem:[%s3820_s6 + $0x58] sm:$0xf]  ;;  %113 = vst [vmem:[#allocation3 + $0x4c] sm:$0xf] %v112_v17 }
  0x26   :  { %115 = vst [vmem:[#allocation3 + $0x50] sm:$0xf] %v114_v18  ;;  %117 = vst [vmem:[#allocation3 + $0x54] sm:$0xf] %v116_v19  ;;  %v118_v20 = vld [vmem:[%s3820_s6 + $0x4c] sm:$0xf] }
  0x27   :  { %v120_v21 = vld [vmem:[%s3820_s6 + $0x5c] sm:$0xff]   ;;  %v124_v22 = vld [vmem:[%s3820_s6 + $0x70] sm:$0xf]  ;;  %119 = vst [vmem:[#allocation3 + $0x58] sm:$0xf] %v118_v20  ;;  %v3825_v58 = vmov 0  }
  0x28   :  { %121 = vst [vmem:[#allocation3 + $0x5c] sm:$0xff] %v120_v21   ;;  %125 = vst [vmem:[#allocation3 + $0x64] sm:$0xf] %v124_v22  ;;  %v126_v23 = vld [vmem:[%s3820_s6 + $0x64] sm:$0xf]  ;;  %v136_v28 = vld [vmem:[%s3820_s6 + $0x7c] sm:$0xff]   ;;  %2841 = vset.pattern.permute.xlu0 %v3825_v58 }
  0x29   :  { %v128_v24 = vld [vmem:[%s3820_s6 + $0x74] sm:$0xf]  ;;  %v130_v25 = vld [vmem:[%s3820_s6 + $0x68] sm:$0xf]  ;;  %127 = vst [vmem:[#allocation3 + $0x68] sm:$0xf] %v126_v23 }
  0x2a   :  { %129 = vst [vmem:[#allocation3 + $0x6c] sm:$0xf] %v128_v24  ;;  %131 = vst [vmem:[#allocation3 + $0x70] sm:$0xf] %v130_v25  ;;  %v132_v26 = vld [vmem:[%s3820_s6 + $0x78] sm:$0xf] }
  0x2b   :  { %v134_v27 = vld [vmem:[%s3820_s6 + $0x6c] sm:$0xf]  ;;  %133 = vst [vmem:[#allocation3 + $0x74] sm:$0xf] %v132_v26  ;;  %137 = vst [vmem:[#allocation3 + $0x7c] sm:$0xff] %v136_v28   ;;  %v152_v35 = vld [vmem:[%s3820_s6 + $0x9c] sm:$0xff]  }
  0x2c   :  { %135 = vst [vmem:[#allocation3 + $0x78] sm:$0xf] %v134_v27  ;;  %v140_v29 = vld [vmem:[%s3820_s6 + $0x90] sm:$0xf]  ;;  %v142_v30 = vld [vmem:[%s3820_s6 + $0x84] sm:$0xf] }
  0x2d   :  { %v144_v31 = vld [vmem:[%s3820_s6 + $0x94] sm:$0xf]  ;;  %141 = vst [vmem:[#allocation3 + $0x84] sm:$0xf] %v140_v29  ;;  %143 = vst [vmem:[#allocation3 + $0x88] sm:$0xf] %v142_v30 }
  0x2e   :  { %145 = vst [vmem:[#allocation3 + $0x8c] sm:$0xf] %v144_v31  ;;  %v146_v32 = vld [vmem:[%s3820_s6 + $0x88] sm:$0xf]  ;;  %v148_v33 = vld [vmem:[%s3820_s6 + $0x98] sm:$0xf] }
  0x2f   :  { %v150_v34 = vld [vmem:[%s3820_s6 + $0x8c] sm:$0xf]  ;;  %147 = vst [vmem:[#allocation3 + $0x90] sm:$0xf] %v146_v32  ;;  %149 = vst [vmem:[#allocation3 + $0x94] sm:$0xf] %v148_v33 }
  0x30   :  { %151 = vst [vmem:[#allocation3 + $0x98] sm:$0xf] %v150_v34  ;;  %v156_v36 = vld [vmem:[%s3820_s6 + $0xb0] sm:$0xf]  ;;  %v158_v37 = vld [vmem:[%s3820_s6 + $0xa4] sm:$0xf] }
  0x31   :  { %153 = vst [vmem:[#allocation3 + $0x9c] sm:$0xff] %v152_v35   ;;  %157 = vst [vmem:[#allocation3 + $0xa4] sm:$0xf] %v156_v36  ;;  %v160_v38 = vld [vmem:[%s3820_s6 + $0xb4] sm:$0xf]  ;;  %v168_v42 = vld [vmem:[%s3820_s6 + $0xbc] sm:$0xff]  }
  0x32   :  { %159 = vst [vmem:[#allocation3 + $0xa8] sm:$0xf] %v158_v37  ;;  %v162_v39 = vld [vmem:[%s3820_s6 + $0xa8] sm:$0xf]  ;;  %v164_v40 = vld [vmem:[%s3820_s6 + $0xb8] sm:$0xf] }
  0x33   :  { %161 = vst [vmem:[#allocation3 + $0xac] sm:$0xf] %v160_v38  ;;  %163 = vst [vmem:[#allocation3 + $0xb0] sm:$0xf] %v162_v39  ;;  %v166_v41 = vld [vmem:[%s3820_s6 + $0xac] sm:$0xf] }
  0x34   :  { %165 = vst [vmem:[#allocation3 + $0xb4] sm:$0xf] %v164_v40  ;;  %v172_v43 = vld [vmem:[%s3820_s6 + $0xd0] sm:$0xf]  ;;  %167 = vst [vmem:[#allocation3 + $0xb8] sm:$0xf] %v166_v41 }
  0x35   :  { %169 = vst [vmem:[#allocation3 + $0xbc] sm:$0xff] %v168_v42   ;;  %173 = vst [vmem:[#allocation3 + $0xc4] sm:$0xf] %v172_v43  ;;  %v174_v44 = vld [vmem:[%s3820_s6 + $0xc4] sm:$0xf]  ;;  %v184_v49 = vld [vmem:[%s3820_s6 + $0xdc] sm:$0xff]  }
  0x36   :  { %v176_v45 = vld [vmem:[%s3820_s6 + $0xd4] sm:$0xf]  ;;  %v178_v46 = vld [vmem:[%s3820_s6 + $0xc8] sm:$0xf]  ;;  %175 = vst [vmem:[#allocation3 + $0xc8] sm:$0xf] %v174_v44 }
  0x37   :  { %177 = vst [vmem:[#allocation3 + $0xcc] sm:$0xf] %v176_v45  ;;  %179 = vst [vmem:[#allocation3 + $0xd0] sm:$0xf] %v178_v46  ;;  %v180_v47 = vld [vmem:[%s3820_s6 + $0xd8] sm:$0xf] }
  0x38   :  { %v182_v48 = vld [vmem:[%s3820_s6 + $0xcc] sm:$0xf]  ;;  %181 = vst [vmem:[#allocation3 + $0xd4] sm:$0xf] %v180_v47  ;;  %185 = vst [vmem:[#allocation3 + $0xdc] sm:$0xff] %v184_v49   ;;  %v2995_v59 = vmov 1  }
  0x39   :  { %183 = vst [vmem:[#allocation3 + $0xd8] sm:$0xf] %v182_v48  ;;  %v188_v50 = vld [vmem:[%s3820_s6 + $0xf0] sm:$0xf]  ;;  %v190_v51 = vld [vmem:[%s3820_s6 + $0xe4] sm:$0xf]  ;;  %2843 = vset.pattern.permute.xlu1 %v2995_v59 }
  0x3a   :  { %v192_v52 = vld [vmem:[%s3820_s6 + $0xf4] sm:$0xf]  ;;  %189 = vst [vmem:[#allocation3 + $0xe4] sm:$0xf] %v188_v50  ;;  %191 = vst [vmem:[#allocation3 + $0xe8] sm:$0xf] %v190_v51 }
  0x3b   :  { %193 = vst [vmem:[#allocation3 + $0xec] sm:$0xf] %v192_v52  ;;  %v194_v53 = vld [vmem:[%s3820_s6 + $0xe8] sm:$0xf]  ;;  %v196_v54 = vld [vmem:[%s3820_s6 + $0xf8] sm:$0xf] }
  0x3c   :  { %v198_v55 = vld [vmem:[%s3820_s6 + $0xec] sm:$0xf]  ;;  %195 = vst [vmem:[#allocation3 + $0xf0] sm:$0xf] %v194_v53  ;;  %197 = vst [vmem:[#allocation3 + $0xf4] sm:$0xf] %v196_v54 }
  0x3d   :  { %199 = vst [vmem:[#allocation3 + $0xf8] sm:$0xf] %v198_v55  ;;  %v200_v56 = vld [vmem:[%s3820_s6 + $0xfc] sm:$0xf]  ;;  %v611_v57 = vld [vmem:[%s3817_s3] sm:$0x1f] }
  0x3e   :  { %201 = vst [vmem:[#allocation3 + $0xfc] sm:$0xf] %v200_v56  ;;  %s2413_s15 = sld [smem:[#allocation5 + $0x3]]  ;;  %s362_s16 = sld [smem:[#allocation5]]  ;;  %614 = vperm.xlu0 %2841, %v611_v57   ;;  %714 = vperm.xlu1 %2843, %v611_v57  }
  0x3f   :  { %s2414_s17 = sld [smem:[#allocation5 + $0x1]]  ;;  %s3248_s18 = sld [smem:[#allocation5 + $0x2]] }
  0x40   :  { %360 = vsyncadd [#allocation4 + $0x1], 4096  ;;  %v2996_v60 = vmov 3   ;;  %v2997_v61 = vmov 2   ;;  %v363_v62 = vld [vmem:[%s3814_s0] sm:$0xff]  ;;  %v364_v63 = vld [vmem:[%s3814_s0 + $0x8] sm:$0xff] }
  0x41   :  { %v365_v0 = vld [vmem:[%s3814_s0 + $0x10] sm:$0xff]  ;;  %v366_v1 = vld [vmem:[%s3814_s0 + $0x18] sm:$0xff]  ;;  %v2415_v3 = vld [vmem:[%s3814_s0 + $0x20] sm:$0xff]  ;;  %vm897_vm0 = vcmask 1044480  }
  0x42   :  { %2842 = vset.pattern.permute.xlu0 %v2996_v60  ;;  %2844 = vset.pattern.permute.xlu1 %v2997_v61  ;;  %v2416_v8 = vld [vmem:[%s3814_s0 + $0x28] sm:$0xff]  ;;  %v2417_v9 = vld [vmem:[%s3814_s0 + $0x30] sm:$0xff]  ;;  %v2418_v10 = vld [vmem:[%s3814_s0 + $0x38] sm:$0xff] }
  0x43   :  { %702 = vperm.xlu0 %2842, %v611_v57   ;;  %806 = vperm.xlu1 %2844, %v611_v57   ;;  %v2420_v17 = vld [vmem:[%s3814_s0 + $0x40] sm:$0xff]  ;;  %v2421_v22 = vld [vmem:[%s3814_s0 + $0x48] sm:$0xff]  ;;  %v2422_v23 = vld [vmem:[%s3814_s0 + $0x50] sm:$0xff] }
  0x44   :  { %v3262_v2 = vstv %s362_s16  ;;  %v3280_v11 = vstv %s2413_s15  ;;  %v2423_v24 = vld [vmem:[%s3814_s0 + $0x58] sm:$0xff]  ;;  %v3310_v54 = vld [vmem:[%s3815_s1] sm:$0x77] }
  0x45   :  { %v368_v4 = vmul.f32 %v3262_v2, %v363_v62  ;;  %v369_v5 = vmul.f32 %v3262_v2, %v364_v63  ;;  %v370_v6 = vmul.f32 %v3262_v2, %v365_v0  ;;  %v371_v7 = vmul.f32 %v3262_v2, %v366_v1  ;;  %v3315_v55 = vld [vmem:[%s3815_s1 + $0x8] sm:$0x77]  ;;  %v3320_v56 = vld [vmem:[%s3815_s1 + $0x10] sm:$0x77]  ;;  %v3325_v57 = vld [vmem:[%s3815_s1 + $0x18] sm:$0x77] }
  0x46   :  { %v383_v12 = vstv %s2414_s17  ;;  %v398_v25 = vstv %s3248_s18  ;;  %v435_v59 = vmul.f32 %v3310_v54, %v3262_v2  ;;  %v437_v63 = vmul.f32 %v3320_v56, %v3262_v2 }
  0x47   :  { %v373_v13 = vadd.f32 %v3280_v11, %v368_v4  ;;  %v374_v14 = vadd.f32 %v3280_v11, %v369_v5  ;;  %v375_v15 = vadd.f32 %v3280_v11, %v370_v6  ;;  %v376_v16 = vadd.f32 %v3280_v11, %v371_v7  ;;  %2845 = vset.pattern.permute.xlu0 %v2997_v61 }
  0x48   :  { %v384_v18 = vmul.f32 %v2415_v3, %v383_v12  ;;  %v385_v19 = vmul.f32 %v2416_v8, %v383_v12  ;;  %v386_v20 = vmul.f32 %v2417_v9, %v383_v12  ;;  %v387_v21 = vmul.f32 %v2418_v10, %v383_v12 }
  0x49   :  { %v399_v30 = vmul.f32 %v2420_v17, %v398_v25  ;;  %v400_v31 = vmul.f32 %v2421_v22, %v398_v25  ;;  %v401_v32 = vmul.f32 %v2422_v23, %v398_v25  ;;  %v402_v33 = vmul.f32 %v2423_v24, %v398_v25 }
  0x4a   :  { %v388_v26 = vadd.f32 %v384_v18, %v373_v13  ;;  %v389_v27 = vadd.f32 %v385_v19, %v374_v14  ;;  %v390_v28 = vadd.f32 %v386_v20, %v375_v15  ;;  %v391_v29 = vadd.f32 %v387_v21, %v376_v16 }
  0x4b   :  { %v443_v60 = vmul.f32 %v3310_v54, %v383_v12  ;;  %v436_v61 = vmul.f32 %v3315_v55, %v3262_v2  ;;  %v444_v62 = vmul.f32 %v3315_v55, %v383_v12  ;;  %v445_v0 = vmul.f32 %v3320_v56, %v383_v12 }
  0x4c   :  { %v403_v34 = vadd.f32 %v399_v30, %v388_v26  ;;  %v404_v35 = vadd.f32 %v400_v31, %v389_v27  ;;  %v405_v36 = vadd.f32 %v401_v32, %v390_v28  ;;  %v406_v37 = vadd.f32 %v402_v33, %v391_v29  ;;  %v3360_v33 = vld [vmem:[%s3821_s7 + $0x4] ss:$0 sm:$0xff] }
  0x4d   :  { %v438_v1 = vmul.f32 %v3325_v57, %v3262_v2  ;;  %v446_v3 = vmul.f32 %v3325_v57, %v383_v12  ;;  %v439_v4 = vadd.f32 %v435_v59, %v3280_v11  ;;  %v2428_v5 = vrot.slane %v443_v60, 9  ;;  %3844 = vst [vmem:[#allocation24_spill] sm:$0xff] %v3360_v33 }
  0x4e   :  { %v2424_v38 = vmul.f32 -1.442695, %v403_v34  ;;  %v2425_v39 = vmul.f32 -1.442695, %v404_v35  ;;  %v2426_v40 = vmul.f32 -1.442695, %v405_v36  ;;  %v467_v6 = vmul.f32 %v3310_v54, %v398_v25 }
  0x4f   :  { %v2427_v41 = vmul.f32 -1.442695, %v406_v37  ;;  %v440_v7 = vadd.f32 %v436_v61, %v3280_v11  ;;  %v2429_v8 = vrot.slane %v444_v62, 9  ;;  %v468_v9 = vmul.f32 %v3315_v55, %v398_v25  ;;  %v3365_v34 = vld [vmem:[%s3821_s7 + $0x6] ss:$0 sm:$0xff] }
  0x50   :  { %2846 = vpow2.f32 %v2424_v38  ;;  %v441_v10 = vadd.f32 %v437_v63, %v3280_v11  ;;  %v2430_v13 = vrot.slane %v445_v0, 9  ;;  %v469_v14 = vmul.f32 %v3320_v56, %v398_v25  ;;  %3845 = vst [vmem:[#allocation25_spill] sm:$0xff] %v3365_v34  ;;  %v3370_v35 = vld [vmem:[%s3821_s7 + $0x1] ss:$2 sm:$0xf] }
  0x51   :  { %2848 = vpow2.f32 %v2425_v39  ;;  %v442_v15 = vadd.f32 %v438_v1, %v3280_v11  ;;  %v2431_v2 = vrot.slane %v446_v3, 9  ;;  %v470_v12 = vmul.f32 %v3325_v57, %v398_v25  ;;  %v3350_v11 = vld [vmem:[%s3821_s7] ss:$0 sm:$0xff]  ;;  %v3355_v25 = vld [vmem:[%s3821_s7 + $0x2] ss:$0 sm:$0xff]  ;;  %3846 = vst [vmem:[#allocation26_spill] sm:$0xff] %v3370_v35 }
  0x52   :  { %2850 = vpow2.f32 %v2426_v40  ;;  %v463_v16 = vadd.f32 %v2428_v5, %v439_v4  ;;  %v2432_v17 = vrot.slane %v467_v6, 10  ;;  %v464_v18 = vadd.f32 %v2429_v8, %v440_v7  ;;  %3842 = vst [vmem:[#allocation22_spill] sm:$0xff] %v3350_v11  ;;  %3843 = vst [vmem:[#allocation23_spill] sm:$0xff] %v3355_v25 }
  0x53   :  { %2852 = vpow2.f32 %v2427_v41  ;;  %v2433_v19 = vrot.slane %v468_v9, 10  ;;  %v465_v20 = vadd.f32 %v2430_v13, %v441_v10  ;;  %v2434_v21 = vrot.slane %v469_v14, 10 }
  0x54   :  { %v466_v22 = vadd.f32 %v2431_v2, %v442_v15  ;;  %v2435_v23 = vrot.slane %v470_v12, 10  ;;  %v487_v24 = vadd.f32 %v2432_v17, %v463_v16 }
  0x55   :  { %v488_v26 = vadd.f32 %v2433_v19, %v464_v18  ;;  %v489_v27 = vadd.f32 %v2434_v21, %v465_v20 }
  0x56   :  { %v490_v28 = vadd.f32 %v2435_v23, %v466_v22  ;;  %v2436_v29 = vmul.f32 -1.442695, %v487_v24 }
  0x57   :  { %v2437_v30 = vmul.f32 -1.442695, %v488_v26  ;;  %v2438_v31 = vmul.f32 -1.442695, %v489_v27 }
  0x58   :  { %v2439_v32 = vmul.f32 -1.442695, %v490_v28 }
  0x5a   :  { %v2847_v42 = vpop.eup %2846 }
  0x5b   :  { %v2849_v43 = vpop.eup %2848  ;;  %v419_v44 = vadd.f32 1.0, %v2847_v42 }
  0x5c   :  { %v2851_v45 = vpop.eup %2850  ;;  %v420_v46 = vadd.f32 1.0, %v2849_v43 }
  0x5d   :  { %v2853_v47 = vpop.eup %2852  ;;  %v421_v48 = vadd.f32 1.0, %v2851_v45  ;;  %2854 = vrcp.f32 %v419_v44  ;;  %v519_v44 = vlaneseq }
  0x5e   :  { %v422_v49 = vadd.f32 1.0, %v2853_v47  ;;  %2856 = vrcp.f32 %v420_v46 }
  0x5f   :  { %2858 = vrcp.f32 %v421_v48  ;;  %v3372_v45 = vshrl.u32 %v519_v44, 7 }
  0x60   :  { %2860 = vrcp.f32 %v422_v49 }
  0x61   :  { %2862 = vpow2.f32 %v2436_v29  ;;  %3847 = vst [vmem:[#allocation27_spill] sm:$0xff] %v3372_v45  ;;  %v3375_v47 = vsub.s32 0, %v3372_v45  ;;  %v525_v48 = vsub.s32 4, %v3372_v45  ;;  %v3396_v24 = vsub.s32 1, %v3372_v45 }
  0x62   :  { %2864 = vpow2.f32 %v2437_v30  ;;  %v723_v26 = vsub.s32 5, %v3372_v45 }
  0x63   :  { %2866 = vpow2.f32 %v2438_v31  ;;  %3848 = vst [vmem:[#allocation28_spill] sm:$0xff] %v3375_v47  ;;  %3849 = vst [vmem:[#allocation29_spill] sm:$0xff] %v3396_v24 }
  0x64   :  { %2868 = vpow2.f32 %v2439_v32 }
  0x67   :  { %v3299_v50 = vpop.eup %2854 }
  0x68   :  { %3838 = vst [vmem:[#allocation18_spill] sm:$0xff] %v3299_v50  ;;  %v3301_v51 = vpop.eup %2856 }
  0x69   :  { %3839 = vst [vmem:[#allocation19_spill] sm:$0xff] %v3301_v51  ;;  %v3303_v52 = vpop.eup %2858 }
  0x6a   :  { %3840 = vst [vmem:[#allocation20_spill] sm:$0xff] %v3303_v52  ;;  %v3305_v53 = vpop.eup %2860 }
  0x6b   :  { %3841 = vst [vmem:[#allocation21_spill] sm:$0xff] %v3305_v53  ;;  %v2863_v36 = vpop.eup %2862 }
  0x6c   :  { %v2865_v37 = vpop.eup %2864  ;;  %v503_v40 = vadd.f32 1.0, %v2863_v36 }
  0x6d   :  { %v2867_v38 = vpop.eup %2866  ;;  %v504_v41 = vadd.f32 1.0, %v2865_v37 }
  0x6e   :  { %v2869_v39 = vpop.eup %2868  ;;  %v505_v42 = vadd.f32 1.0, %v2867_v38  ;;  %2870 = vrcp.f32 %v503_v40 }
  0x6f   :  { %v506_v43 = vadd.f32 1.0, %v2869_v39  ;;  %2872 = vrcp.f32 %v504_v41 }
  0x70   :  { %2874 = vrcp.f32 %v505_v42 }
  0x71   :  { %2876 = vrcp.f32 %v506_v43 }
  0x78   :  { %v2871_v46 = vpop.eup %2870 }
  0x79   :  { %v2873_v49 = vpop.eup %2872  ;;  %v522_v61 = vrot.slane %v2871_v46, %v3375_v47  ;;  %v526_v62 = vrot.slane %v2871_v46, %v525_v48 }
  0x7a   :  { %v2875_v59 = vpop.eup %2874  ;;  %v530_v63 = vrot.slane %v2873_v49, %v3375_v47  ;;  %v534_v0 = vrot.slane %v2873_v49, %v525_v48 }
  0x7b   :  { %v2877_v60 = vpop.eup %2876  ;;  %v538_v1 = vrot.slane %v2875_v59, %v3375_v47  ;;  %v542_v3 = vrot.slane %v2875_v59, %v525_v48  ;;  %v562_v6 = vrot.slane %v522_v61, %v3375_v47  ;;  %v566_v7 = vrot.slane %v526_v62, %v3375_v47 }
  0x7c   :  { %v546_v4 = vrot.slane %v2877_v60, %v3375_v47  ;;  %v550_v5 = vrot.slane %v2877_v60, %v525_v48  ;;  %v570_v8 = vrot.slane %v530_v63, %v3375_v47  ;;  %v574_v9 = vrot.slane %v534_v0, %v3375_v47 }
  0x7d   :  { %v578_v10 = vrot.slane %v538_v1, %v3375_v47  ;;  %v582_v13 = vrot.slane %v542_v3, %v3375_v47  ;;  %v599_v2 = vcombine.low %v562_v6, %v566_v7 }
  0x7e   :  { %v586_v14 = vrot.slane %v546_v4, %v3375_v47  ;;  %v590_v15 = vrot.slane %v550_v5, %v3375_v47  ;;  %v600_v12 = vcombine.low %v570_v8, %v574_v9 }
  0x7f   :  { %v601_v16 = vcombine.low %v578_v10, %v582_v13  ;;  %v607_v18 = vmul.f32 %v599_v2, %v3310_v54 }
  0x80   :  { %v602_v17 = vcombine.low %v586_v14, %v590_v15  ;;  %v608_v19 = vmul.f32 %v600_v12, %v3315_v55 }
  0x81   :  { %v609_v20 = vmul.f32 %v601_v16, %v3320_v56  ;;  %v624_v22 = vrot.slane %v607_v18, %v3375_v47  ;;  %v628_v23 = vrot.slane %v607_v18, %v525_v48  ;;  %v3403_v56 = vsub.s32 2, %v3372_v45 }
  0x82   :  { %v610_v21 = vmul.f32 %v602_v17, %v3325_v57  ;;  %v632_v27 = vrot.slane %v608_v19, %v3375_v47  ;;  %v636_v28 = vrot.slane %v608_v19, %v525_v48  ;;  %v815_v57 = vsub.s32 6, %v3372_v45 }
  0x83   :  { %v640_v29 = vrot.slane %v609_v20, %v3375_v47  ;;  %v644_v54 = vrot.slane %v609_v20, %v525_v48  ;;  %3850 = vst [vmem:[#allocation30_spill] sm:$0xff] %v3403_v56  ;;  %v3407_v31 = vrot.slane %v624_v22, %v3375_v47  ;;  %v3410_v32 = vrot.slane %v628_v23, %v3375_v47 }
  0x84   :  { %v648_v55 = vrot.slane %v610_v21, %v3375_v47  ;;  %v652_v30 = vrot.slane %v610_v21, %v525_v48  ;;  %v720_v36 = vrot.slane %v607_v18, %v3396_v24  ;;  %v724_v37 = vrot.slane %v607_v18, %v723_v26 }
  0x85   :  { %v3414_v38 = vrot.slane %v632_v27, %v3375_v47  ;;  %v3417_v39 = vrot.slane %v636_v28, %v3375_v47  ;;  %v3420_v40 = vrot.slane %v640_v29, %v3375_v47  ;;  %v3423_v41 = vrot.slane %v644_v54, %v3375_v47 }
  0x86   :  { %v3426_v42 = vrot.slane %v648_v55, %v3375_v47  ;;  %v3429_v43 = vrot.slane %v652_v30, %v3375_v47  ;;  %v728_v44 = vrot.slane %v608_v19, %v3396_v24  ;;  %v732_v46 = vrot.slane %v608_v19, %v723_v26 }
  0x87   :  { %v736_v48 = vrot.slane %v609_v20, %v3396_v24  ;;  %v740_v49 = vrot.slane %v609_v20, %v723_v26  ;;  %v744_v59 = vrot.slane %v610_v21, %v3396_v24  ;;  %v748_v60 = vrot.slane %v610_v21, %v723_v26 }
  0x88   :  { %v812_v61 = vrot.slane %v607_v18, %v3403_v56  ;;  %v816_v62 = vrot.slane %v607_v18, %v815_v57  ;;  %v820_v63 = vrot.slane %v608_v19, %v3403_v56  ;;  %v824_v0 = vrot.slane %v608_v19, %v815_v57 }
  0x89   :  { %v828_v1 = vrot.slane %v609_v20, %v3403_v56  ;;  %v832_v3 = vrot.slane %v609_v20, %v815_v57  ;;  %v836_v4 = vrot.slane %v610_v21, %v3403_v56  ;;  %v840_v5 = vrot.slane %v610_v21, %v815_v57 }
  0x8a   :  { %v3439_v6 = vrot.slane %v720_v36, %v3396_v24  ;;  %v3442_v7 = vrot.slane %v724_v37, %v3396_v24  ;;  %v3445_v8 = vrot.slane %v728_v44, %v3396_v24  ;;  %v3448_v9 = vrot.slane %v732_v46, %v3396_v24 }
  0x8b   :  { %v3451_v10 = vrot.slane %v736_v48, %v3396_v24  ;;  %v3454_v13 = vrot.slane %v740_v49, %v3396_v24  ;;  %v3457_v14 = vrot.slane %v744_v59, %v3396_v24  ;;  %v3460_v15 = vrot.slane %v748_v60, %v3396_v24 }
  0x8c   :  { %v3463_v12 = vrot.slane %v812_v61, %v3403_v56  ;;  %v3466_v16 = vrot.slane %v816_v62, %v3403_v56  ;;  %v3469_v17 = vrot.slane %v820_v63, %v3403_v56  ;;  %v3472_v18 = vrot.slane %v824_v0, %v3403_v56 }
  0x8d   :  { %v3475_v20 = vrot.slane %v828_v1, %v3403_v56  ;;  %v3478_v21 = vrot.slane %v832_v3, %v3403_v56  ;;  %v3481_v22 = vrot.slane %v836_v4, %v3403_v56  ;;  %v3484_v23 = vrot.slane %v840_v5, %v3403_v56 }
  0x8f   :  { %3851 = vst [vmem:[#allocation31_spill] sm:$0xff] %v3475_v20  ;;  %3852 = vst [vmem:[#allocation32_spill] sm:$0xff] %v3478_v21 }
  0x90   :  { %3853 = vst [vmem:[#allocation33_spill] sm:$0xff] %v3481_v22  ;;  %3854 = vst [vmem:[#allocation34_spill] sm:$0xff] %v3484_v23 }
  0xbd   :  { %v615_v2 = vpop.permute.xlu0 %614  ;;  %v715_v19 = vpop.permute.xlu1 %714 }
  0xbe   :  { %v693_v26 = vmul.f32 %v3407_v31, %v615_v2  ;;  %v694_v27 = vmul.f32 %v3410_v32, %v615_v2  ;;  %v695_v28 = vmul.f32 %v3414_v38, %v615_v2  ;;  %v696_v29 = vmul.f32 %v3417_v39, %v615_v2 }
  0xbf   :  { %v697_v54 = vmul.f32 %v3420_v40, %v615_v2  ;;  %v698_v55 = vmul.f32 %v3423_v41, %v615_v2  ;;  %v699_v30 = vmul.f32 %v3426_v42, %v615_v2  ;;  %v700_v57 = vmul.f32 %v3429_v43, %v615_v2 }
  0xc0   :  { %v789_v36 = vmul.f32 %v3439_v6, %v715_v19  ;;  %v790_v37 = vmul.f32 %v3442_v7, %v715_v19  ;;  %v791_v44 = vmul.f32 %v3445_v8, %v715_v19  ;;  %v792_v46 = vmul.f32 %v3448_v9, %v715_v19 }
  0xc1   :  { %v793_v49 = vmul.f32 %v3451_v10, %v715_v19  ;;  %v794_v59 = vmul.f32 %v3454_v13, %v715_v19  ;;  %v795_v60 = vmul.f32 %v3457_v14, %v715_v19  ;;  %v796_v61 = vmul.f32 %v3460_v15, %v715_v19 }
  0xc2   :  { %v703_v48 = vpop.permute.xlu0 %702  ;;  %v807_v58 = vpop.permute.xlu1 %806 }
  0xc3   :  { %v705_v62 = vadd.f32 %v703_v48, %v693_v26  ;;  %v706_v63 = vadd.f32 %v703_v48, %v694_v27  ;;  %v707_v0 = vadd.f32 %v703_v48, %v695_v28  ;;  %v708_v1 = vadd.f32 %v703_v48, %v696_v29 }
  0xc4   :  { %v709_v3 = vadd.f32 %v703_v48, %v697_v54  ;;  %v710_v4 = vadd.f32 %v703_v48, %v698_v55  ;;  %v711_v5 = vadd.f32 %v703_v48, %v699_v30  ;;  %v712_v2 = vadd.f32 %v703_v48, %v700_v57 }
  0xc5   :  { %v797_v34 = vadd.f32 %v789_v36, %v705_v62  ;;  %v798_v33 = vadd.f32 %v790_v37, %v706_v63  ;;  %v799_v24 = vadd.f32 %v791_v44, %v707_v0  ;;  %v800_v56 = vadd.f32 %v792_v46, %v708_v1 }
  0xc6   :  { %v801_v35 = vadd.f32 %v793_v49, %v709_v3  ;;  %v802_v47 = vadd.f32 %v794_v59, %v710_v4  ;;  %v803_v45 = vadd.f32 %v795_v60, %v711_v5  ;;  %v804_v53 = vadd.f32 %v796_v61, %v712_v2 }
  0xc7   :  { %v881_v52 = vmul.f32 %v3463_v12, %v807_v58  ;;  %v882_v19 = vmul.f32 %v3466_v16, %v807_v58  ;;  %v883_v26 = vmul.f32 %v3469_v17, %v807_v58  ;;  %v884_v27 = vmul.f32 %v3472_v18, %v807_v58 }
  0xc8   :  { %v885_v28 = vmul.f32 %v3475_v20, %v807_v58  ;;  %v886_v29 = vmul.f32 %v3478_v21, %v807_v58  ;;  %v887_v54 = vmul.f32 %v3481_v22, %v807_v58  ;;  %v888_v55 = vmul.f32 %v3484_v23, %v807_v58 }
  0xc9   :  { %v3510_v30 = vadd.f32 %v881_v52, %v797_v34  ;;  %v3512_v57 = vadd.f32 %v882_v19, %v798_v33  ;;  %v3514_v36 = vadd.f32 %v883_v26, %v799_v24  ;;  %v3516_v37 = vadd.f32 %v884_v27, %v800_v56 }
  0xca   :  { %v3518_v44 = vadd.f32 %v885_v28, %v801_v35  ;;  %v3520_v46 = vadd.f32 %v886_v29, %v802_v47  ;;  %v3522_v48 = vadd.f32 %v887_v54, %v803_v45  ;;  %v3524_v49 = vadd.f32 %v888_v55, %v804_v53 }
  0xcb   :  { %v898_v59 = vsel %vm897_vm0, %v3510_v30, -inf  ;;  %v905_v58 = vsel %vm897_vm0, %v3512_v57, -inf  ;;  %v912_v52 = vsel %vm897_vm0, %v3514_v36, -inf  ;;  %v919_v33 = vsel %vm897_vm0, %v3516_v37, -inf }
  0xcc   :  { %v899_v34 = vrot.slane %v898_v59, 4  ;;  %v906_v35 = vrot.slane %v905_v58, 4  ;;  %v913_v47 = vrot.slane %v912_v52, 4  ;;  %v920_v24 = vrot.slane %v919_v33, 4 }
  0xcd   :  { %v926_v53 = vsel %vm897_vm0, %v3518_v44, -inf  ;;  %v933_v45 = vsel %vm897_vm0, %v3520_v46, -inf  ;;  %v940_v56 = vsel %vm897_vm0, %v3522_v48, -inf  ;;  %v947_v60 = vsel %vm897_vm0, %v3524_v49, -inf }
  0xce   :  { %v900_v61 = vmax.f32 %v898_v59, %v899_v34  ;;  %v907_v62 = vmax.f32 %v905_v58, %v906_v35  ;;  %v914_v63 = vmax.f32 %v912_v52, %v913_v47  ;;  %v921_v0 = vmax.f32 %v919_v33, %v920_v24 }
  0xcf   :  { %v927_v1 = vrot.slane %v926_v53, 4  ;;  %v934_v3 = vrot.slane %v933_v45, 4  ;;  %v941_v4 = vrot.slane %v940_v56, 4  ;;  %v948_v5 = vrot.slane %v947_v60, 4 }
  0xd0   :  { %v901_v2 = vrot.slane %v900_v61, 2  ;;  %v908_v19 = vrot.slane %v907_v62, 2  ;;  %v915_v26 = vrot.slane %v914_v63, 2  ;;  %v922_v27 = vrot.slane %v921_v0, 2 }
  0xd1   :  { %v928_v28 = vmax.f32 %v926_v53, %v927_v1  ;;  %v935_v29 = vmax.f32 %v933_v45, %v934_v3  ;;  %v942_v54 = vmax.f32 %v940_v56, %v941_v4  ;;  %v949_v55 = vmax.f32 %v947_v60, %v948_v5 }
  0xd2   :  { %v902_v51 = vmax.f32 %v900_v61, %v901_v2  ;;  %v909_v50 = vmax.f32 %v907_v62, %v908_v19  ;;  %v916_v25 = vmax.f32 %v914_v63, %v915_v26  ;;  %v923_v11 = vmax.f32 %v921_v0, %v922_v27 }
  0xd3   :  { %v929_v59 = vrot.slane %v928_v28, 2  ;;  %v936_v58 = vrot.slane %v935_v29, 2  ;;  %v943_v52 = vrot.slane %v942_v54, 2  ;;  %v950_v33 = vrot.slane %v949_v55, 2 }
  0xd4   :  { %v903_v34 = vrot.slane %v902_v51, 1  ;;  %v910_v35 = vrot.slane %v909_v50, 1  ;;  %v917_v47 = vrot.slane %v916_v25, 1  ;;  %v924_v24 = vrot.slane %v923_v11, 1 }
  0xd5   :  { %v930_v22 = vmax.f32 %v928_v28, %v929_v59  ;;  %v937_v20 = vmax.f32 %v935_v29, %v936_v58  ;;  %v944_v23 = vmax.f32 %v942_v54, %v943_v52  ;;  %v951_v21 = vmax.f32 %v949_v55, %v950_v33 }
  0xd6   :  { %v904_v53 = vmax.f32 %v902_v51, %v903_v34  ;;  %v911_v45 = vmax.f32 %v909_v50, %v910_v35  ;;  %v918_v56 = vmax.f32 %v916_v25, %v917_v47  ;;  %v925_v60 = vmax.f32 %v923_v11, %v924_v24 }
  0xd7   :  { %v931_v61 = vrot.slane %v930_v22, 1  ;;  %v938_v62 = vrot.slane %v937_v20, 1  ;;  %v945_v63 = vrot.slane %v944_v23, 1  ;;  %v952_v0 = vrot.slane %v951_v21, 1 }
  0xd8   :  { %v954_v1 = vsub.f32 %v3510_v30, %v904_v53  ;;  %v955_v3 = vsub.f32 %v3512_v57, %v911_v45  ;;  %v956_v4 = vsub.f32 %v3514_v36, %v918_v56  ;;  %v957_v5 = vsub.f32 %v3516_v37, %v925_v60 }
  0xd9   :  { %v932_v2 = vmax.f32 %v930_v22, %v931_v61  ;;  %v939_v19 = vmax.f32 %v937_v20, %v938_v62  ;;  %v946_v26 = vmax.f32 %v944_v23, %v945_v63  ;;  %v953_v27 = vmax.f32 %v951_v21, %v952_v0 }
  0xda   :  { %v962_v51 = vmul.f32 1.442695, %v954_v1  ;;  %v964_v50 = vmul.f32 1.442695, %v955_v3  ;;  %v966_v25 = vmul.f32 1.442695, %v956_v4 }
  0xdb   :  { %v958_v11 = vsub.f32 %v3518_v44, %v932_v2  ;;  %v959_v28 = vsub.f32 %v3520_v46, %v939_v19  ;;  %v960_v29 = vsub.f32 %v3522_v48, %v946_v26  ;;  %v961_v30 = vsub.f32 %v3524_v49, %v953_v27 }
  0xdc   :  { %2878 = vpow2.f32 %v962_v51  ;;  %v968_v57 = vmul.f32 1.442695, %v957_v5 }
  0xdd   :  { %2880 = vpow2.f32 %v964_v50  ;;  %v970_v36 = vmul.f32 1.442695, %v958_v11  ;;  %v972_v37 = vmul.f32 1.442695, %v959_v28  ;;  %v974_v20 = vmul.f32 1.442695, %v960_v29 }
  0xde   :  { %2882 = vpow2.f32 %v966_v25  ;;  %v976_v21 = vmul.f32 1.442695, %v961_v30 }
  0xdf   :  { %2884 = vpow2.f32 %v968_v57 }
  0xe0   :  { %2886 = vpow2.f32 %v970_v36 }
  0xe1   :  { %2888 = vpow2.f32 %v972_v37 }
  0xe2   :  { %2890 = vpow2.f32 %v974_v20 }
  0xe3   :  { %2892 = vpow2.f32 %v976_v21 }
  0xe6   :  { %v3550_v22 = vpop.eup %2878 }
  0xe7   :  { %v3552_v23 = vpop.eup %2880  ;;  %v978_v44 = vsel %vm897_vm0, %v3550_v22, 0.0 }
  0xe8   :  { %v3556_v46 = vpop.eup %2882  ;;  %v979_v48 = vrot.slane %v978_v44, 4  ;;  %v985_v49 = vsel %vm897_vm0, %v3552_v23, 0.0 }
  0xe9   :  { %v3560_v54 = vpop.eup %2884  ;;  %v986_v55 = vrot.slane %v985_v49, 4  ;;  %v992_v59 = vsel %vm897_vm0, %v3556_v46, 0.0 }
  0xea   :  { %v3564_v58 = vpop.eup %2886  ;;  %v980_v52 = vadd.f32 %v979_v48, %v978_v44  ;;  %v993_v33 = vrot.slane %v992_v59, 4  ;;  %v999_v34 = vsel %vm897_vm0, %v3560_v54, 0.0 }
  0xeb   :  { %v3568_v35 = vpop.eup %2888  ;;  %v987_v47 = vadd.f32 %v986_v55, %v985_v49  ;;  %v1000_v24 = vrot.slane %v999_v34, 4  ;;  %v1006_v53 = vsel %vm897_vm0, %v3564_v58, 0.0 }
  0xec   :  { %v3572_v45 = vpop.eup %2890  ;;  %v981_v56 = vrot.slane %v980_v52, 2  ;;  %v994_v60 = vadd.f32 %v993_v33, %v992_v59  ;;  %v1007_v61 = vrot.slane %v1006_v53, 4  ;;  %v1013_v62 = vsel %vm897_vm0, %v3568_v35, 0.0 }
  0xed   :  { %v3576_v63 = vpop.eup %2892  ;;  %v988_v0 = vrot.slane %v987_v47, 2  ;;  %v1001_v1 = vadd.f32 %v1000_v24, %v999_v34  ;;  %v1014_v3 = vrot.slane %v1013_v62, 4  ;;  %v1020_v4 = vsel %vm897_vm0, %v3572_v45, 0.0 }
  0xee   :  { %v982_v5 = vadd.f32 %v981_v56, %v980_v52  ;;  %v995_v2 = vrot.slane %v994_v60, 2  ;;  %v1008_v19 = vadd.f32 %v1007_v61, %v1006_v53  ;;  %v1021_v26 = vrot.slane %v1020_v4, 4 }
  0xef   :  { %v989_v27 = vadd.f32 %v988_v0, %v987_v47  ;;  %v1002_v51 = vrot.slane %v1001_v1, 2  ;;  %v1015_v50 = vadd.f32 %v1014_v3, %v1013_v62  ;;  %v1027_v25 = vsel %vm897_vm0, %v3576_v63, 0.0 }
  0xf0   :  { %v983_v11 = vrot.slane %v982_v5, 1  ;;  %v996_v28 = vadd.f32 %v995_v2, %v994_v60  ;;  %v1009_v29 = vrot.slane %v1008_v19, 2  ;;  %v1022_v30 = vadd.f32 %v1021_v26, %v1020_v4 }
  0xf1   :  { %v990_v57 = vrot.slane %v989_v27, 1  ;;  %v1003_v36 = vadd.f32 %v1002_v51, %v1001_v1  ;;  %v1016_v37 = vrot.slane %v1015_v50, 2  ;;  %v1028_v20 = vrot.slane %v1027_v25, 4 }
  0xf2   :  { %v984_v21 = vadd.f32 %v983_v11, %v982_v5  ;;  %v997_v44 = vrot.slane %v996_v28, 1  ;;  %v1010_v48 = vadd.f32 %v1009_v29, %v1008_v19  ;;  %v1023_v49 = vrot.slane %v1022_v30, 2 }
  0xf3   :  { %v991_v55 = vadd.f32 %v990_v57, %v989_v27  ;;  %v1004_v59 = vrot.slane %v1003_v36, 1  ;;  %v1017_v52 = vadd.f32 %v1016_v37, %v1015_v50  ;;  %v1029_v33 = vadd.f32 %v1028_v20, %v1027_v25 }
  0xf4   :  { %v998_v34 = vadd.f32 %v997_v44, %v996_v28  ;;  %v1011_v47 = vrot.slane %v1010_v48, 1  ;;  %v1024_v24 = vadd.f32 %v1023_v49, %v1022_v30  ;;  %2894 = vrcp.f32 %v984_v21 }
  0xf5   :  { %v1005_v53 = vadd.f32 %v1004_v59, %v1003_v36  ;;  %v1018_v56 = vrot.slane %v1017_v52, 1  ;;  %v1030_v60 = vrot.slane %v1029_v33, 2  ;;  %2896 = vrcp.f32 %v991_v55 }
  0xf6   :  { %v1012_v61 = vadd.f32 %v1011_v47, %v1010_v48  ;;  %v1025_v62 = vrot.slane %v1024_v24, 1  ;;  %2898 = vrcp.f32 %v998_v34 }
  0xf7   :  { %v1019_v0 = vadd.f32 %v1018_v56, %v1017_v52  ;;  %v1031_v1 = vadd.f32 %v1030_v60, %v1029_v33  ;;  %2900 = vrcp.f32 %v1005_v53 }
  0xf8   :  { %v1026_v3 = vadd.f32 %v1025_v62, %v1024_v24  ;;  %2902 = vrcp.f32 %v1012_v61 }
  0xf9   :  { %v1032_v4 = vrot.slane %v1031_v1, 1  ;;  %2904 = vrcp.f32 %v1019_v0 }
  0xfa   :  { %2906 = vrcp.f32 %v1026_v3 }
  0xfb   :  { %v1033_v5 = vadd.f32 %v1032_v4, %v1031_v1 }
  0xfd   :  { %2908 = vrcp.f32 %v1033_v5 }
  0xfe   :  { %v2895_v2 = vpop.eup %2894 }
  0xff   :  { %v2897_v19 = vpop.eup %2896  ;;  %v3583_v26 = vmul.f32 %v2895_v2, %v3550_v22 }
 0x100   :  { %v2899_v27 = vpop.eup %2898  ;;  %v3586_v51 = vmul.f32 %v2897_v19, %v3552_v23 }
 0x101   :  { %v2901_v50 = vpop.eup %2900  ;;  %v3589_v25 = vmul.f32 %v2899_v27, %v3556_v46 }
 0x102   :  { %v2903_v11 = vpop.eup %2902  ;;  %v3592_v28 = vmul.f32 %v2901_v50, %v3560_v54 }
 0x103   :  { %v2905_v29 = vpop.eup %2904  ;;  %v3595_v30 = vmul.f32 %v2903_v11, %v3564_v58 }
 0x104   :  { %v2907_v57 = vpop.eup %2906  ;;  %v3598_v22 = vmul.f32 %v2905_v29, %v3568_v35 }
 0x105   :  { %v3601_v36 = vmul.f32 %v2907_v57, %v3572_v45 }
 0x107   :  { %v2909_v23 = vpop.eup %2908 }
 0x108   :  { %v3604_v37 = vmul.f32 %v2909_v23, %v3576_v63 }
 0x109   :  { %2986 = dma.done.wait [#allocation4], 24576 }
 0x10a   :  { %2987 = vsyncadd [#allocation4], 4294942720  ;;  %v1141_v46 = vmul.f32 %v3586_v51, %v3442_v7  ;;  %v1143_v54 = vmul.f32 %v3592_v28, %v3448_v9  ;;  %v1164_v35 = vld [vmem:[#allocation2 + $0x240] sm:$0xff]  ;;  %v1165_v63 = vld [vmem:[#allocation2 + $0x248] sm:$0xff]  ;;  %v1140_v11 = vmul.f32 %v3583_v26, %v3439_v6  ;;  %v1142_v29 = vmul.f32 %v3589_v25, %v3445_v8 }
 0x10b   :  { %v1180_v21 = vld [vmem:[#allocation2 + $0x2c0] sm:$0xff]  ;;  %2467 = vmatprep.subr.bf16.mxu0 %v1164_v35  ;;  %v1181_v48 = vld [vmem:[#allocation2 + $0x2c8] sm:$0xff]  ;;  %v1166_v55 = vld [vmem:[#allocation2 + $0x250] sm:$0xff]  ;;  %vm2999_vm1 = vmmov 0  }
 0x10c   :  { %v1149_v58 = vpack.c.bf16 %v1141_v46, %v1141_v46  ;;  %v1151_v20 = vpack.c.bf16 %v1143_v54, %v1143_v54  ;;  %v1156_v45 = vld [vmem:[#allocation2 + $0x200] sm:$0xff]  ;;  %2489 = vmatprep.subr.bf16.mxu1 %v1180_v21  ;;  %v1157_v7 = vld [vmem:[#allocation2 + $0x208] sm:$0xff]  ;;  %v1182_v9 = vld [vmem:[#allocation2 + $0x2d0] sm:$0xff]  ;;  %v1148_v35 = vpack.c.bf16 %v1140_v11, %v1140_v11  ;;  %v1150_v21 = vpack.c.bf16 %v1142_v29, %v1142_v29 }
 0x10d   :  { %v1172_v44 = vld [vmem:[#allocation2 + $0x280] sm:$0xff]  ;;  %2468 = vmatpush3.bf16.msra.mxu0 %v1156_v45  ;;  %v1173_v49 = vld [vmem:[#allocation2 + $0x288] sm:$0xff]  ;;  %v1158_v59 = vld [vmem:[#allocation2 + $0x210] sm:$0xff] }
 0x10e   :  { %1252 = vmatprep.mubr.bf16.mxu0 %v1149_v58  ;;  %1292 = vmatprep.mubr.bf16.mxu1 %v1151_v20  ;;  %v1174_v52 = vld [vmem:[#allocation2 + $0x290] sm:$0xff]  ;;  %v1167_v33 = vld [vmem:[#allocation2 + $0x258] sm:$0xff]  ;;  %v1168_v53 = vld [vmem:[#allocation2 + $0x260] sm:$0xff]  ;;  %v1145_v58 = vmul.f32 %v3598_v22, %v3454_v13  ;;  %v1147_v20 = vmul.f32 %v3604_v37, %v3460_v15 }
 0x10f   :  { %2490 = vmatpush3.bf16.msra.mxu1 %v1172_v44  ;;  %2469 = vmatprep.subr.bf16.mxu0 %v1165_v63  ;;  %v1183_v34 = vld [vmem:[#allocation2 + $0x2d8] sm:$0xff]  ;;  %v1184_v56 = vld [vmem:[#allocation2 + $0x2e0] sm:$0xff]  ;;  %v1169_v62 = vld [vmem:[#allocation2 + $0x268] sm:$0xff] }
 0x110   :  { %2491 = vmatprep.subr.bf16.mxu1 %v1181_v48  ;;  %v1159_v47 = vld [vmem:[#allocation2 + $0x218] sm:$0xff]  ;;  %v1160_v60 = vld [vmem:[#allocation2 + $0x220] sm:$0xff]  ;;  %v1185_v0 = vld [vmem:[#allocation2 + $0x2e8] sm:$0xff]  ;;  %v1153_v63 = vpack.c.bf16 %v1145_v58, %v1145_v58  ;;  %v1155_v48 = vpack.c.bf16 %v1147_v20, %v1147_v20 }
 0x111   :  { %2470 = vmatpush3.bf16.msra.mxu0 %v1157_v7  ;;  %v1175_v24 = vld [vmem:[#allocation2 + $0x298] sm:$0xff]  ;;  %v1176_v61 = vld [vmem:[#allocation2 + $0x2a0] sm:$0xff]  ;;  %v1161_v1 = vld [vmem:[#allocation2 + $0x228] sm:$0xff] }
 0x112   :  { %2471 = vmatprep.subr.bf16.mxu0 %v1166_v55  ;;  %v1177_v3 = vld [vmem:[#allocation2 + $0x2a8] sm:$0xff]  ;;  %v1170_v4 = vld [vmem:[#allocation2 + $0x270] sm:$0xff]  ;;  %v1171_v27 = vld [vmem:[#allocation2 + $0x278] sm:$0xff] }
 0x113   :  { %2492 = vmatpush3.bf16.msra.mxu1 %v1173_v49  ;;  %v1186_v5 = vld [vmem:[#allocation2 + $0x2f0] sm:$0xff]  ;;  %v1187_v50 = vld [vmem:[#allocation2 + $0x2f8] sm:$0xff]  ;;  %v1196_v46 = vld [vmem:[#allocation2 + $0x340] sm:$0xff] }
 0x114   :  { %2493 = vmatprep.subr.bf16.mxu1 %v1182_v9  ;;  %v1162_v2 = vld [vmem:[#allocation2 + $0x230] sm:$0xff]  ;;  %v1163_v57 = vld [vmem:[#allocation2 + $0x238] sm:$0xff]  ;;  %v1212_v54 = vld [vmem:[#allocation2 + $0x3c0] sm:$0xff] }
 0x115   :  { %2472 = vmatpush3.bf16.msra.mxu0 %v1158_v59  ;;  %v1178_v19 = vld [vmem:[#allocation2 + $0x2b0] sm:$0xff]  ;;  %v1179_v23 = vld [vmem:[#allocation2 + $0x2b8] sm:$0xff]  ;;  %v1188_v6 = vld [vmem:[#allocation2 + $0x300] sm:$0xff] }
 0x116   :  { %2473 = vmatprep.subr.bf16.mxu0 %v1167_v33  ;;  %v1204_v8 = vld [vmem:[#allocation2 + $0x380] sm:$0xff]  ;;  %v1197_v45 = vld [vmem:[#allocation2 + $0x348] sm:$0xff]  ;;  %v1198_v7 = vld [vmem:[#allocation2 + $0x350] sm:$0xff] }
 0x117   :  { %2494 = vmatpush3.bf16.msra.mxu1 %v1174_v52  ;;  %v1213_v44 = vld [vmem:[#allocation2 + $0x3c8] sm:$0xff]  ;;  %v1214_v49 = vld [vmem:[#allocation2 + $0x3d0] sm:$0xff]  ;;  %v1199_v59 = vld [vmem:[#allocation2 + $0x358] sm:$0xff] }
 0x118   :  { %2495 = vmatprep.subr.bf16.mxu1 %v1183_v34  ;;  %v1189_v13 = vld [vmem:[#allocation2 + $0x308] sm:$0xff]  ;;  %v1190_v55 = vld [vmem:[#allocation2 + $0x310] sm:$0xff]  ;;  %v1215_v52 = vld [vmem:[#allocation2 + $0x3d8] sm:$0xff] }
 0x119   :  { %2474 = vmatpush3.bf16.msra.mxu0 %v1159_v47  ;;  %v1205_v15 = vld [vmem:[#allocation2 + $0x388] sm:$0xff]  ;;  %v1206_v9 = vld [vmem:[#allocation2 + $0x390] sm:$0xff]  ;;  %v1191_v33 = vld [vmem:[#allocation2 + $0x318] sm:$0xff] }
 0x11a   :  { %2475 = vmatprep.subr.bf16.mxu0 %v1168_v53  ;;  %v1207_v34 = vld [vmem:[#allocation2 + $0x398] sm:$0xff]  ;;  %v1200_v47 = vld [vmem:[#allocation2 + $0x360] sm:$0xff] }
 0x11b   :  { %2496 = vmatpush3.bf16.msra.mxu1 %v1175_v24  ;;  %v1216_v24 = vld [vmem:[#allocation2 + $0x3e0] sm:$0xff]  ;;  %v1195_v11 = vld [vmem:[#allocation2 + $0x338] sm:$0xff] }
 0x11c   :  { %2497 = vmatprep.subr.bf16.mxu1 %v1184_v56  ;;  %v1192_v53 = vld [vmem:[#allocation2 + $0x320] sm:$0xff]  ;;  %v1211_v29 = vld [vmem:[#allocation2 + $0x3b8] sm:$0xff] }
 0x11d   :  { %2476 = vmatpush3.bf16.msra.mxu0 %v1160_v60  ;;  %v1208_v56 = vld [vmem:[#allocation2 + $0x3a0] sm:$0xff]  ;;  %v1201_v60 = vld [vmem:[#allocation2 + $0x368] sm:$0xff] }
 0x11e   :  { %2477 = vmatprep.subr.bf16.mxu0 %v1169_v62  ;;  %v1193_v62 = vld [vmem:[#allocation2 + $0x328] sm:$0xff] }
 0x11f   :  { %2498 = vmatpush3.bf16.msra.mxu1 %v1176_v61  ;;  %v1217_v61 = vld [vmem:[#allocation2 + $0x3e8] sm:$0xff] }
 0x120   :  { %2499 = vmatprep.subr.bf16.mxu1 %v1185_v0  ;;  %v1209_v0 = vld [vmem:[#allocation2 + $0x3a8] sm:$0xff] }
 0x121   :  { %2478 = vmatpush3.bf16.msra.mxu0 %v1161_v1  ;;  %v1202_v1 = vld [vmem:[#allocation2 + $0x370] sm:$0xff] }
 0x122   :  { %2479 = vmatprep.subr.bf16.mxu0 %v1170_v4  ;;  %v1194_v4 = vld [vmem:[#allocation2 + $0x330] sm:$0xff] }
 0x123   :  { %2500 = vmatpush3.bf16.msra.mxu1 %v1177_v3  ;;  %v1218_v3 = vld [vmem:[#allocation2 + $0x3f0] sm:$0xff] }
 0x124   :  { %2501 = vmatprep.subr.bf16.mxu1 %v1186_v5  ;;  %v1210_v5 = vld [vmem:[#allocation2 + $0x3b0] sm:$0xff] }
 0x125   :  { %2480 = vmatpush3.bf16.msra.mxu0 %v1162_v2  ;;  %v1203_v2 = vld [vmem:[#allocation2 + $0x378] sm:$0xff] }
 0x126   :  { %2481 = vmatprep.subr.bf16.mxu0 %v1171_v27  ;;  %v1144_v27 = vmul.f32 %v3595_v30, %v3451_v10  ;;  %v1076_v10 = vld [vmem:[#allocation2] sm:$0xff] }
 0x127   :  { %2502 = vmatpush3.bf16.msra.mxu1 %v1178_v19  ;;  %v1219_v19 = vld [vmem:[#allocation2 + $0x3f8] sm:$0xff] }
 0x128   :  { %2503 = vmatprep.subr.bf16.mxu1 %v1187_v50  ;;  %v1146_v50 = vmul.f32 %v3601_v36, %v3457_v14  ;;  %v1152_v58 = vpack.c.bf16 %v1144_v27, %v1144_v27  ;;  %v1092_v14 = vld [vmem:[#allocation2 + $0x80] sm:$0xff]  ;;  %v1065_v27 = vmul.f32 %v3598_v22, %v3423_v41  ;;  %v1109_v41 = vld [vmem:[#allocation2 + $0x108] sm:$0xff] }
 0x129   :  { %2482 = vmatpush3.bf16.msra.mxu0 %v1163_v57  ;;  %v1084_v57 = vld [vmem:[#allocation2 + $0x40] sm:$0xff] }
 0x12a   :  { %2511 = vmatprep.subr.bf16.mxu0 %v1196_v46  ;;  %v1061_v46 = vmul.f32 %v3586_v51, %v3410_v32  ;;  %v1154_v20 = vpack.c.bf16 %v1146_v50, %v1146_v50  ;;  %v1086_v32 = vld [vmem:[#allocation2 + $0x50] sm:$0xff]  ;;  %v1067_v50 = vmul.f32 %v3604_v37, %v3429_v43  ;;  %v1125_v43 = vld [vmem:[#allocation2 + $0x188] sm:$0xff] }
 0x12b   :  { %2504 = vmatpush3.bf16.msra.mxu1 %v1179_v23  ;;  %v1100_v23 = vld [vmem:[#allocation2 + $0xc0] sm:$0xff] }
 0x12c   :  { %2533 = vmatprep.subr.bf16.mxu1 %v1212_v54  ;;  %1253 = vmatmul.mubr.bf16.vlgmr.msra.gmra.mrb[0].mxu0 %v1148_v35  ;;  %v1063_v54 = vmul.f32 %v3592_v28, %v3417_v39  ;;  %v1085_v35 = vld [vmem:[#allocation2 + $0x48] sm:$0xff]  ;;  %v1102_v39 = vld [vmem:[#allocation2 + $0xd0] sm:$0xff] }
 0x12d   :  { %2512 = vmatpush3.bf16.msra.mxu0 %v1188_v6  ;;  %1332 = vmatprep.mubr.bf16.mxu0 %v1153_v63  ;;  %v1069_v6 = vpack.c.bf16 %v1061_v46, %v1061_v46  ;;  %v1078_v63 = vld [vmem:[#allocation2 + $0x10] sm:$0xff]  ;;  %v1073_v46 = vpack.c.bf16 %v1065_v27, %v1065_v27  ;;  %v1567_v27 = vld [vmem:[#allocation2 + $0x458] sm:$0xff] }
 0x12e   :  { %1293 = vmatmul.mubr.bf16.vlgmr.msra.gmra.mrb[0].mxu1 %v1150_v21  ;;  %2513 = vmatprep.subr.bf16.mxu0 %v1197_v45  ;;  %v1101_v21 = vld [vmem:[#allocation2 + $0xc8] sm:$0xff] }
 0x12f   :  { %2534 = vmatpush3.bf16.msra.mxu1 %v1204_v8  ;;  %1372 = vmatprep.mubr.bf16.mxu1 %v1155_v48  ;;  %v1071_v8 = vpack.c.bf16 %v1063_v54, %v1063_v54  ;;  %v1077_v45 = vld [vmem:[#allocation2 + $0x8] sm:$0xff]  ;;  %v1094_v48 = vld [vmem:[#allocation2 + $0x90] sm:$0xff]  ;;  %v1075_v54 = vpack.c.bf16 %v1067_v50, %v1067_v50  ;;  %v1583_v50 = vld [vmem:[#allocation2 + $0x4d8] sm:$0xff] }
 0x130   :  { %2535 = vmatprep.subr.bf16.mxu1 %v1213_v44  ;;  %v1093_v44 = vld [vmem:[#allocation2 + $0x88] sm:$0xff] }
 0x131   :  { %2514 = vmatpush3.bf16.msra.mxu0 %v1189_v13  ;;  %v1087_v13 = vld [vmem:[#allocation2 + $0x58] sm:$0xff] }
 0x132   :  { %2515 = vmatprep.subr.bf16.mxu0 %v1198_v7  ;;  %v1079_v7 = vld [vmem:[#allocation2 + $0x18] sm:$0xff] }
 0x133   :  { %2536 = vmatpush3.bf16.msra.mxu1 %v1205_v15  ;;  %v1103_v15 = vld [vmem:[#allocation2 + $0xd8] sm:$0xff] }
 0x134   :  { %2537 = vmatprep.subr.bf16.mxu1 %v1214_v49  ;;  %v1095_v49 = vld [vmem:[#allocation2 + $0x98] sm:$0xff] }
 0x135   :  { %2516 = vmatpush3.bf16.msra.mxu0 %v1190_v55  ;;  %v1088_v55 = vld [vmem:[#allocation2 + $0x60] sm:$0xff] }
 0x136   :  { %2517 = vmatprep.subr.bf16.mxu0 %v1199_v59  ;;  %v1080_v59 = vld [vmem:[#allocation2 + $0x20] sm:$0xff] }
 0x137   :  { %2538 = vmatpush3.bf16.msra.mxu1 %v1206_v9  ;;  %v1104_v9 = vld [vmem:[#allocation2 + $0xe0] sm:$0xff] }
 0x138   :  { %2539 = vmatprep.subr.bf16.mxu1 %v1215_v52  ;;  %v1096_v52 = vld [vmem:[#allocation2 + $0xa0] sm:$0xff] }
 0x139   :  { %2518 = vmatpush3.bf16.msra.mxu0 %v1191_v33  ;;  %v1089_v33 = vld [vmem:[#allocation2 + $0x68] sm:$0xff] }
 0x13a   :  { %2519 = vmatprep.subr.bf16.mxu0 %v1200_v47  ;;  %v1081_v47 = vld [vmem:[#allocation2 + $0x28] sm:$0xff] }
 0x13b   :  { %2540 = vmatpush3.bf16.msra.mxu1 %v1207_v34  ;;  %v1105_v34 = vld [vmem:[#allocation2 + $0xe8] sm:$0xff] }
 0x13c   :  { %2541 = vmatprep.subr.bf16.mxu1 %v1216_v24  ;;  %v1097_v24 = vld [vmem:[#allocation2 + $0xa8] sm:$0xff] }
 0x13d   :  { %2520 = vmatpush3.bf16.msra.mxu0 %v1192_v53  ;;  %v1090_v53 = vld [vmem:[#allocation2 + $0x70] sm:$0xff] }
 0x13e   :  { %2521 = vmatprep.subr.bf16.mxu0 %v1201_v60  ;;  %v1082_v60 = vld [vmem:[#allocation2 + $0x30] sm:$0xff] }
 0x13f   :  { %2542 = vmatpush3.bf16.msra.mxu1 %v1208_v56  ;;  %v1106_v56 = vld [vmem:[#allocation2 + $0xf0] sm:$0xff] }
 0x140   :  { %2543 = vmatprep.subr.bf16.mxu1 %v1217_v61  ;;  %v1098_v61 = vld [vmem:[#allocation2 + $0xb0] sm:$0xff] }
 0x141   :  { %2522 = vmatpush3.bf16.msra.mxu0 %v1193_v62  ;;  %v1091_v62 = vld [vmem:[#allocation2 + $0x78] sm:$0xff] }
 0x142   :  { %2523 = vmatprep.subr.bf16.mxu0 %v1202_v1  ;;  %v1060_v1 = vmul.f32 %v3583_v26, %v3407_v31  ;;  %v1108_v31 = vld [vmem:[#allocation2 + $0x100] sm:$0xff] }
 0x143   :  { %2544 = vmatpush3.bf16.msra.mxu1 %v1209_v0  ;;  %v1107_v0 = vld [vmem:[#allocation2 + $0xf8] sm:$0xff] }
 0x144   :  { %2545 = vmatprep.subr.bf16.mxu1 %v1218_v3  ;;  %v1062_v3 = vmul.f32 %v3589_v25, %v3414_v38  ;;  %v1124_v38 = vld [vmem:[#allocation2 + $0x180] sm:$0xff] }
 0x145   :  { %2524 = vmatpush3.bf16.msra.mxu0 %v1194_v4  ;;  %v1083_v4 = vld [vmem:[#allocation2 + $0x38] sm:$0xff] }
 0x146   :  { %2525 = vmatprep.subr.bf16.mxu0 %v1203_v2  ;;  %v1116_v2 = vld [vmem:[#allocation2 + $0x140] sm:$0xff] }
 0x147   :  { %2546 = vmatpush3.bf16.msra.mxu1 %v1210_v5  ;;  %v1099_v5 = vld [vmem:[#allocation2 + $0xb8] sm:$0xff] }
 0x148   :  { %2547 = vmatprep.subr.bf16.mxu1 %v1219_v19  ;;  %v1132_v19 = vld [vmem:[#allocation2 + $0x1c0] sm:$0xff] }
 0x149   :  { %2526 = vmatpush3.bf16.msra.mxu0 %v1195_v11  ;;  %v1068_v11 = vpack.c.bf16 %v1060_v1, %v1060_v1  ;;  %v1565_v1 = vld [vmem:[#allocation2 + $0x448] sm:$0xff] }
 0x14a   :  { %2555 = vmatprep.subr.bf16.mxu0 %v1084_v57  ;;  %v1117_v57 = vld [vmem:[#allocation2 + $0x148] sm:$0xff] }
 0x14b   :  { %2548 = vmatpush3.bf16.msra.mxu1 %v1211_v29  ;;  %v1070_v29 = vpack.c.bf16 %v1062_v3, %v1062_v3  ;;  %v1581_v3 = vld [vmem:[#allocation2 + $0x4c8] sm:$0xff] }
 0x14c   :  { %2577 = vmatprep.subr.bf16.mxu1 %v1100_v23  ;;  %1333 = vmatmul.mubr.bf16.vlgmr.msra.gmra.mrb[4].mxu0 %v1152_v58  ;;  %v1133_v23 = vld [vmem:[#allocation2 + $0x1c8] sm:$0xff]  ;;  %v1118_v58 = vld [vmem:[#allocation2 + $0x150] sm:$0xff] }
 0x14d   :  { %2556 = vmatpush3.bf16.msra.mxu0 %v1076_v10  ;;  %1412 = vmatprep.mubr.bf16.mxu0 %v1069_v6  ;;  %v1110_v10 = vld [vmem:[#allocation2 + $0x110] sm:$0xff]  ;;  %v1111_v6 = vld [vmem:[#allocation2 + $0x118] sm:$0xff] }
 0x14e   :  { %1373 = vmatmul.mubr.bf16.vlgmr.msra.gmra.mrb[4].mxu1 %v1154_v20  ;;  %2557 = vmatprep.subr.bf16.mxu0 %v1085_v35  ;;  %v1134_v20 = vld [vmem:[#allocation2 + $0x1d0] sm:$0xff]  ;;  %v1119_v35 = vld [vmem:[#allocation2 + $0x158] sm:$0xff] }
 0x14f   :  { %2578 = vmatpush3.bf16.msra.mxu1 %v1092_v14  ;;  %1452 = vmatprep.mubr.bf16.mxu1 %v1071_v8  ;;  %v1126_v14 = vld [vmem:[#allocation2 + $0x190] sm:$0xff]  ;;  %v1127_v8 = vld [vmem:[#allocation2 + $0x198] sm:$0xff] }
 0x150   :  { %2579 = vmatprep.subr.bf16.mxu1 %v1101_v21  ;;  %v1135_v21 = vld [vmem:[#allocation2 + $0x1d8] sm:$0xff] }
 0x151   :  { %2558 = vmatpush3.bf16.msra.mxu0 %v1077_v45  ;;  %v1120_v45 = vld [vmem:[#allocation2 + $0x160] sm:$0xff] }
 0x152   :  { %2559 = vmatprep.subr.bf16.mxu0 %v1086_v32  ;;  %v1112_v32 = vld [vmem:[#allocation2 + $0x120] sm:$0xff] }
 0x153   :  { %2580 = vmatpush3.bf16.msra.mxu1 %v1093_v44  ;;  %v1136_v44 = vld [vmem:[#allocation2 + $0x1e0] sm:$0xff] }
 0x154   :  { %2581 = vmatprep.subr.bf16.mxu1 %v1102_v39  ;;  %v1128_v39 = vld [vmem:[#allocation2 + $0x1a0] sm:$0xff] }
 0x155   :  { %2560 = vmatpush3.bf16.msra.mxu0 %v1078_v63  ;;  %v1121_v63 = vld [vmem:[#allocation2 + $0x168] sm:$0xff] }
 0x156   :  { %2561 = vmatprep.subr.bf16.mxu0 %v1087_v13  ;;  %v1113_v13 = vld [vmem:[#allocation2 + $0x128] sm:$0xff] }
 0x157   :  { %2582 = vmatpush3.bf16.msra.mxu1 %v1094_v48  ;;  %v1137_v48 = vld [vmem:[#allocation2 + $0x1e8] sm:$0xff] }
 0x158   :  { %2583 = vmatprep.subr.bf16.mxu1 %v1103_v15  ;;  %v1129_v15 = vld [vmem:[#allocation2 + $0x1a8] sm:$0xff] }
 0x159   :  { %2562 = vmatpush3.bf16.msra.mxu0 %v1079_v7  ;;  %v1122_v7 = vld [vmem:[#allocation2 + $0x170] sm:$0xff] }
 0x15a   :  { %2563 = vmatprep.subr.bf16.mxu0 %v1088_v55  ;;  %v1114_v55 = vld [vmem:[#allocation2 + $0x130] sm:$0xff] }
 0x15b   :  { %2584 = vmatpush3.bf16.msra.mxu1 %v1095_v49  ;;  %v1138_v49 = vld [vmem:[#allocation2 + $0x1f0] sm:$0xff] }
 0x15c   :  { %2585 = vmatprep.subr.bf16.mxu1 %v1104_v9  ;;  %v1130_v9 = vld [vmem:[#allocation2 + $0x1b0] sm:$0xff] }
 0x15d   :  { %2564 = vmatpush3.bf16.msra.mxu0 %v1080_v59  ;;  %v1123_v59 = vld [vmem:[#allocation2 + $0x178] sm:$0xff] }
 0x15e   :  { %2565 = vmatprep.subr.bf16.mxu0 %v1089_v33  ;;  %v1064_v33 = vmul.f32 %v3595_v30, %v3420_v40  ;;  %v1556_v40 = vld [vmem:[#allocation2 + $0x400] sm:$0xff] }
 0x15f   :  { %2586 = vmatpush3.bf16.msra.mxu1 %v1096_v52  ;;  %v1139_v52 = vld [vmem:[#allocation2 + $0x1f8] sm:$0xff] }
 0x160   :  { %2587 = vmatprep.subr.bf16.mxu1 %v1105_v34  ;;  %v1066_v34 = vmul.f32 %v3601_v36, %v3426_v42  ;;  %v1572_v42 = vld [vmem:[#allocation2 + $0x480] sm:$0xff] }
 0x161   :  { %2566 = vmatpush3.bf16.msra.mxu0 %v1081_v47  ;;  %v1115_v47 = vld [vmem:[#allocation2 + $0x138] sm:$0xff] }
 0x162   :  { %2567 = vmatprep.subr.bf16.mxu0 %v1090_v53  ;;  %v1564_v53 = vld [vmem:[#allocation2 + $0x440] sm:$0xff] }
 0x163   :  { %2588 = vmatpush3.bf16.msra.mxu1 %v1097_v24  ;;  %v1131_v24 = vld [vmem:[#allocation2 + $0x1b8] sm:$0xff] }
 0x164   :  { %2589 = vmatprep.subr.bf16.mxu1 %v1106_v56  ;;  %v1580_v56 = vld [vmem:[#allocation2 + $0x4c0] sm:$0xff] }
 0x165   :  { %2568 = vmatpush3.bf16.msra.mxu0 %v1082_v60  ;;  %v1541_v60 = vmul.f32 %v3586_v51, %v3466_v16  ;;  %v1557_v16 = vld [vmem:[#allocation2 + $0x408] sm:$0xff]  ;;  %v1566_v51 = vld [vmem:[#allocation2 + $0x450] sm:$0xff] }
 0x166   :  { %2569 = vmatprep.subr.bf16.mxu0 %v1091_v62  ;;  %v1072_v62 = vpack.c.bf16 %v1064_v33, %v1064_v33  ;;  %v1590_v33 = vld [vmem:[#allocation2 + $0x510] sm:$0xff] }
 0x167   :  { %2590 = vmatpush3.bf16.msra.mxu1 %v1098_v61  ;;  %v1543_v61 = vmul.f32 %v3592_v28, %v3472_v18  ;;  %v1573_v18 = vld [vmem:[#allocation2 + $0x488] sm:$0xff]  ;;  %v1582_v28 = vld [vmem:[#allocation2 + $0x4d0] sm:$0xff] }
 0x168   :  { %2591 = vmatprep.subr.bf16.mxu1 %v1107_v0  ;;  %v1074_v0 = vpack.c.bf16 %v1066_v34, %v1066_v34  ;;  %v1606_v34 = vld [vmem:[#allocation2 + $0x590] sm:$0xff] }
 0x169   :  { %2570 = vmatpush3.bf16.msra.mxu0 %v1083_v4  ;;  %v1549_v4 = vpack.c.bf16 %v1541_v60, %v1541_v60  ;;  %v1600_v60 = vld [vmem:[#allocation2 + $0x560] sm:$0xff] }
 0x16a   :  { %2599 = vmatprep.subr.bf16.mxu0 %v1116_v2  ;;  %v1558_v2 = vld [vmem:[#allocation2 + $0x410] sm:$0xff] }
 0x16b   :  { %2592 = vmatpush3.bf16.msra.mxu1 %v1099_v5  ;;  %v1551_v5 = vpack.c.bf16 %v1543_v61, %v1543_v61  ;;  %v1616_v61 = vld [vmem:[#allocation2 + $0x5e0] sm:$0xff] }
 0x16c   :  { %2621 = vmatprep.subr.bf16.mxu1 %v1132_v19  ;;  %1413 = vmatmul.mubr.bf16.vlgmr.msra.gmra.mrb[8].mxu0 %v1068_v11  ;;  %v1574_v19 = vld [vmem:[#allocation2 + $0x490] sm:$0xff]  ;;  %v1559_v11 = vld [vmem:[#allocation2 + $0x418] sm:$0xff] }
 0x16d   :  { %2600 = vmatpush3.bf16.msra.mxu0 %v1108_v31  ;;  %1492 = vmatprep.mubr.bf16.mxu0 %v1073_v46  ;;  %v1568_v31 = vld [vmem:[#allocation2 + $0x460] sm:$0xff]  ;;  %v1569_v46 = vld [vmem:[#allocation2 + $0x468] sm:$0xff] }
 0x16e   :  { %1453 = vmatmul.mubr.bf16.vlgmr.msra.gmra.mrb[8].mxu1 %v1070_v29  ;;  %2601 = vmatprep.subr.bf16.mxu0 %v1117_v57  ;;  %v1575_v29 = vld [vmem:[#allocation2 + $0x498] sm:$0xff]  ;;  %v1560_v57 = vld [vmem:[#allocation2 + $0x420] sm:$0xff] }
 0x16f   :  { %2622 = vmatpush3.bf16.msra.mxu1 %v1124_v38  ;;  %1532 = vmatprep.mubr.bf16.mxu1 %v1075_v54  ;;  %v1584_v38 = vld [vmem:[#allocation2 + $0x4e0] sm:$0xff]  ;;  %v1585_v54 = vld [vmem:[#allocation2 + $0x4e8] sm:$0xff] }
 0x170   :  { %2623 = vmatprep.subr.bf16.mxu1 %v1133_v23  ;;  %v1576_v23 = vld [vmem:[#allocation2 + $0x4a0] sm:$0xff] }
 0x171   :  { %2602 = vmatpush3.bf16.msra.mxu0 %v1109_v41  ;;  %v1561_v41 = vld [vmem:[#allocation2 + $0x428] sm:$0xff] }
 0x172   :  { %2603 = vmatprep.subr.bf16.mxu0 %v1118_v58  ;;  %v1570_v58 = vld [vmem:[#allocation2 + $0x470] sm:$0xff] }
 0x173   :  { %2624 = vmatpush3.bf16.msra.mxu1 %v1125_v43  ;;  %v1577_v43 = vld [vmem:[#allocation2 + $0x4a8] sm:$0xff] }
 0x174   :  { %2625 = vmatprep.subr.bf16.mxu1 %v1134_v20  ;;  %v1586_v20 = vld [vmem:[#allocation2 + $0x4f0] sm:$0xff] }
 0x175   :  { %2604 = vmatpush3.bf16.msra.mxu0 %v1110_v10  ;;  %v1562_v10 = vld [vmem:[#allocation2 + $0x430] sm:$0xff] }
 0x176   :  { %2605 = vmatprep.subr.bf16.mxu0 %v1119_v35  ;;  %v1571_v35 = vld [vmem:[#allocation2 + $0x478] sm:$0xff] }
 0x177   :  { %2626 = vmatpush3.bf16.msra.mxu1 %v1126_v14  ;;  %v1578_v14 = vld [vmem:[#allocation2 + $0x4b0] sm:$0xff] }
 0x178   :  { %2627 = vmatprep.subr.bf16.mxu1 %v1135_v21  ;;  %v1587_v21 = vld [vmem:[#allocation2 + $0x4f8] sm:$0xff] }
 0x179   :  { %2606 = vmatpush3.bf16.msra.mxu0 %v1111_v6  ;;  %v1540_v6 = vmul.f32 %v3583_v26, %v3463_v12  ;;  %v1588_v12 = vld [vmem:[#allocation2 + $0x500] sm:$0xff]  ;;  %v1597_v26 = vld [vmem:[#allocation2 + $0x548] sm:$0xff] }
 0x17a   :  { %2607 = vmatprep.subr.bf16.mxu0 %v1120_v45  ;;  %v1563_v45 = vld [vmem:[#allocation2 + $0x438] sm:$0xff] }
 0x17b   :  { %2628 = vmatpush3.bf16.msra.mxu1 %v1127_v8  ;;  %v1542_v8 = vmul.f32 %v3589_v25, %v3469_v17  ;;  %v1604_v17 = vld [vmem:[#allocation2 + $0x580] sm:$0xff]  ;;  %v1613_v25 = vld [vmem:[#allocation2 + $0x5c8] sm:$0xff] }
 0x17c   :  { %2629 = vmatprep.subr.bf16.mxu1 %v1136_v44  ;;  %v1579_v44 = vld [vmem:[#allocation2 + $0x4b8] sm:$0xff] }
 0x17d   :  { %2608 = vmatpush3.bf16.msra.mxu0 %v1112_v32  ;;  %v1596_v32 = vld [vmem:[#allocation2 + $0x540] sm:$0xff] }
 0x17e   :  { %2609 = vmatprep.subr.bf16.mxu0 %v1121_v63  ;;  %v3855_v63 = vld [vmem:[#allocation32_spill] sm:$0xff] }
 0x17f   :  { %2630 = vmatpush3.bf16.msra.mxu1 %v1128_v39  ;;  %v1612_v39 = vld [vmem:[#allocation2 + $0x5c0] sm:$0xff] }
 0x180   :  { %2631 = vmatprep.subr.bf16.mxu1 %v1137_v48  ;;  %v1545_v48 = vmul.f32 %v3598_v22, %v3855_v63  ;;  %v1589_v22 = vld [vmem:[#allocation2 + $0x508] sm:$0xff] }
 0x181   :  { %2610 = vmatpush3.bf16.msra.mxu0 %v1113_v13  ;;  %v3856_v13 = vld [vmem:[#allocation34_spill] sm:$0xff] }
 0x182   :  { %2611 = vmatprep.subr.bf16.mxu0 %v1122_v7  ;;  %v1548_v7 = vpack.c.bf16 %v1540_v6, %v1540_v6 }
 0x183   :  { %2632 = vmatpush3.bf16.msra.mxu1 %v1129_v15  ;;  %v1547_v15 = vmul.f32 %v3604_v37, %v3856_v13  ;;  %v1605_v37 = vld [vmem:[#allocation2 + $0x588] sm:$0xff] }
 0x184   :  { %2633 = vmatprep.subr.bf16.mxu1 %v1138_v49  ;;  %v1550_v49 = vpack.c.bf16 %v1542_v8, %v1542_v8 }
 0x185   :  { %2612 = vmatpush3.bf16.msra.mxu0 %v1114_v55  ;;  %v1553_v55 = vpack.c.bf16 %v1545_v48, %v1545_v48 }
 0x186   :  { %2613 = vmatprep.subr.bf16.mxu0 %v1123_v59  ;;  %v1598_v59 = vld [vmem:[#allocation2 + $0x550] sm:$0xff] }
 0x187   :  { %2634 = vmatpush3.bf16.msra.mxu1 %v1130_v9  ;;  %v1555_v9 = vpack.c.bf16 %v1547_v15, %v1547_v15  ;;  %v2910_v15 = vld [vmem:[%s3819_s5] sm:$0xff]  }
 0x188   :  { %2635 = vmatprep.subr.bf16.mxu1 %v1139_v52  ;;  %v1614_v52 = vld [vmem:[#allocation2 + $0x5d0] sm:$0xff] }
 0x189   :  { %2614 = vmatpush3.bf16.msra.mxu0 %v1115_v47  ;;  %v1599_v47 = vld [vmem:[#allocation2 + $0x558] sm:$0xff] }
 0x18a   :  { %2643 = vmatprep.subr.bf16.mxu0 %v1564_v53  ;;  %v1591_v53 = vld [vmem:[#allocation2 + $0x518] sm:$0xff] }
 0x18b   :  { %2636 = vmatpush3.bf16.msra.mxu1 %v1131_v24  ;;  %v1615_v24 = vld [vmem:[#allocation2 + $0x5d8] sm:$0xff] }
 0x18c   :  { %2665 = vmatprep.subr.bf16.mxu1 %v1580_v56  ;;  %1493 = vmatmul.mubr.bf16.vlgmr.msra.gmra.mrb[12].mxu0 %v1072_v62  ;;  %v1607_v56 = vld [vmem:[#allocation2 + $0x598] sm:$0xff]  ;;  %v1592_v62 = vld [vmem:[#allocation2 + $0x520] sm:$0xff] }
 0x18d   :  { %2644 = vmatpush3.bf16.msra.mxu0 %v1556_v40  ;;  %1652 = vmatprep.mubr.bf16.mxu0 %v1549_v4  ;;  %v1601_v40 = vld [vmem:[#allocation2 + $0x568] sm:$0xff]  ;;  %v1602_v4 = vld [vmem:[#allocation2 + $0x570] sm:$0xff] }
 0x18e   :  { %1533 = vmatmul.mubr.bf16.vlgmr.msra.gmra.mrb[12].mxu1 %v1074_v0  ;;  %2645 = vmatprep.subr.bf16.mxu0 %v1565_v1  ;;  %v1608_v0 = vld [vmem:[#allocation2 + $0x5a0] sm:$0xff]  ;;  %v1593_v1 = vld [vmem:[#allocation2 + $0x528] sm:$0xff] }
 0x18f   :  { %2666 = vmatpush3.bf16.msra.mxu1 %v1572_v42  ;;  %1692 = vmatprep.mubr.bf16.mxu1 %v1551_v5  ;;  %v1617_v42 = vld [vmem:[#allocation2 + $0x5e8] sm:$0xff]  ;;  %v1618_v5 = vld [vmem:[#allocation2 + $0x5f0] sm:$0xff] }
 0x190   :  { %2667 = vmatprep.subr.bf16.mxu1 %v1581_v3  ;;  %v1609_v3 = vld [vmem:[#allocation2 + $0x5a8] sm:$0xff] }
 0x191   :  { %2646 = vmatpush3.bf16.msra.mxu0 %v1557_v16  ;;  %v1594_v16 = vld [vmem:[#allocation2 + $0x530] sm:$0xff] }
 0x192   :  { %2647 = vmatprep.subr.bf16.mxu0 %v1566_v51  ;;  %v1603_v51 = vld [vmem:[#allocation2 + $0x578] sm:$0xff] }
 0x193   :  { %2668 = vmatpush3.bf16.msra.mxu1 %v1573_v18  ;;  %v1610_v18 = vld [vmem:[#allocation2 + $0x5b0] sm:$0xff] }
 0x194   :  { %2669 = vmatprep.subr.bf16.mxu1 %v1582_v28  ;;  %v1619_v28 = vld [vmem:[#allocation2 + $0x5f8] sm:$0xff] }
 0x195   :  { %2648 = vmatpush3.bf16.msra.mxu0 %v1558_v2  ;;  %v3857_v2 = vld [vmem:[#allocation31_spill] sm:$0xff] }
 0x196   :  { %2649 = vmatprep.subr.bf16.mxu0 %v1567_v27  ;;  %v3858_v27 = vld [vmem:[#allocation33_spill] sm:$0xff] }
 0x197   :  { %2670 = vmatpush3.bf16.msra.mxu1 %v1574_v19  ;;  %v1544_v19 = vmul.f32 %v3595_v30, %v3857_v2 }
 0x198   :  { %2671 = vmatprep.subr.bf16.mxu1 %v1583_v50  ;;  %v1546_v50 = vmul.f32 %v3601_v36, %v3858_v27 }
 0x199   :  { %2650 = vmatpush3.bf16.msra.mxu0 %v1559_v11  ;;  %v1595_v11 = vld [vmem:[#allocation2 + $0x538] sm:$0xff] }
 0x19a   :  { %2651 = vmatprep.subr.bf16.mxu0 %v1568_v31  ;;  %v1552_v31 = vpack.c.bf16 %v1544_v19, %v1544_v19 }
 0x19b   :  { %2672 = vmatpush3.bf16.msra.mxu1 %v1575_v29  ;;  %v1611_v29 = vld [vmem:[#allocation2 + $0x5b8] sm:$0xff] }
 0x19c   :  { %2673 = vmatprep.subr.bf16.mxu1 %v1584_v38  ;;  %v1554_v38 = vpack.c.bf16 %v1546_v50, %v1546_v50 }
 0x19d   :  { %2652 = vmatpush3.bf16.msra.mxu0 %v1560_v57 }
 0x19e   :  { %2653 = vmatprep.subr.bf16.mxu0 %v1569_v46 }
 0x19f   :  { %2674 = vmatpush3.bf16.msra.mxu1 %v1576_v23 }
 0x1a0   :  { %2675 = vmatprep.subr.bf16.mxu1 %v1585_v54 }
 0x1a1   :  { %2654 = vmatpush3.bf16.msra.mxu0 %v1561_v41 }
 0x1a2   :  { %2655 = vmatprep.subr.bf16.mxu0 %v1570_v58 }
 0x1a3   :  { %2676 = vmatpush3.bf16.msra.mxu1 %v1577_v43 }
 0x1a4   :  { %2677 = vmatprep.subr.bf16.mxu1 %v1586_v20 }
 0x1a5   :  { %2656 = vmatpush3.bf16.msra.mxu0 %v1562_v10 }
 0x1a6   :  { %2657 = vmatprep.subr.bf16.mxu0 %v1571_v35 }
 0x1a7   :  { %2678 = vmatpush3.bf16.msra.mxu1 %v1578_v14 }
 0x1a8   :  { %2679 = vmatprep.subr.bf16.mxu1 %v1587_v21 }
 0x1a9   :  { %2658 = vmatpush3.bf16.msra.mxu0 %v1563_v45 }
 0x1aa   :  { %2687 = vmatprep.subr.bf16.mxu0 %v1596_v32 }
 0x1ab   :  { %2680 = vmatpush3.bf16.msra.mxu1 %v1579_v44 }
 0x1ac   :  { %2709 = vmatprep.subr.bf16.mxu1 %v1612_v39  ;;  %1653 = vmatmul.mubr.bf16.vlgmr.msra.gmra.mrb[16].mxu0 %v1548_v7  ;;  %v2998_v7 = vmov 0.0  }
 0x1ad   :  { %2688 = vmatpush3.bf16.msra.mxu0 %v1588_v12  ;;  %1732 = vmatprep.mubr.bf16.mxu0 %v1553_v55  ;;  %v2912_v12 = vld [vmem:[%s3819_s5 + $0x10] sm:$0xff]  }
 0x1ae   :  { %1693 = vmatmul.mubr.bf16.vlgmr.msra.gmra.mrb[16].mxu1 %v1550_v49  ;;  %2689 = vmatprep.subr.bf16.mxu0 %v1597_v26  ;;  %v2911_v49 = vld [vmem:[%s3819_s5 + $0x8] sm:$0xff]   ;;  %v2914_v26 = vld [vmem:[%s3819_s5 + $0x20] sm:$0xff]   ;;  %v2916_v55 = vld [vmem:[%s3819_s5 + $0x30] sm:$0xff]  }
 0x1af   :  { %2710 = vmatpush3.bf16.msra.mxu1 %v1604_v17  ;;  %1772 = vmatprep.mubr.bf16.mxu1 %v1555_v9  ;;  %v2913_v17 = vld [vmem:[%s3819_s5 + $0x18] sm:$0xff]  }
 0x1b0   :  { %2711 = vmatprep.subr.bf16.mxu1 %v1613_v25  ;;  %v2915_v25 = vld [vmem:[%s3819_s5 + $0x28] sm:$0xff]  }
 0x1b1   :  { %2690 = vmatpush3.bf16.msra.mxu0 %v1589_v22 }
 0x1b2   :  { %2691 = vmatprep.subr.bf16.mxu0 %v1598_v59 }
 0x1b3   :  { %2712 = vmatpush3.bf16.msra.mxu1 %v1605_v37 }
 0x1b4   :  { %2713 = vmatprep.subr.bf16.mxu1 %v1614_v52 }
 0x1b5   :  { %2692 = vmatpush3.bf16.msra.mxu0 %v1590_v33 }
 0x1b6   :  { %2693 = vmatprep.subr.bf16.mxu0 %v1599_v47 }
 0x1b7   :  { %2714 = vmatpush3.bf16.msra.mxu1 %v1606_v34 }
 0x1b8   :  { %2715 = vmatprep.subr.bf16.mxu1 %v1615_v24  ;;  %v2917_v24 = vld [vmem:[%s3819_s5 + $0x38] sm:$0xff]  }
 0x1b9   :  { %2694 = vmatpush3.bf16.msra.mxu0 %v1591_v53 }
 0x1ba   :  { %2695 = vmatprep.subr.bf16.mxu0 %v1600_v60 }
 0x1bb   :  { %2716 = vmatpush3.bf16.msra.mxu1 %v1607_v56 }
 0x1bc   :  { %2717 = vmatprep.subr.bf16.mxu1 %v1616_v61 }
 0x1bd   :  { %2696 = vmatpush3.bf16.msra.mxu0 %v1592_v62 }
 0x1be   :  { %2697 = vmatprep.subr.bf16.mxu0 %v1601_v40 }
 0x1bf   :  { %2718 = vmatpush3.bf16.msra.mxu1 %v1608_v0 }
 0x1c0   :  { %2719 = vmatprep.subr.bf16.mxu1 %v1617_v42 }
 0x1c1   :  { %2698 = vmatpush3.bf16.msra.mxu0 %v1593_v1 }
 0x1c2   :  { %2699 = vmatprep.subr.bf16.mxu0 %v1602_v4 }
 0x1c3   :  { %2720 = vmatpush3.bf16.msra.mxu1 %v1609_v3 }
 0x1c4   :  { %2721 = vmatprep.subr.bf16.mxu1 %v1618_v5 }
 0x1c5   :  { %2700 = vmatpush3.bf16.msra.mxu0 %v1594_v16 }
 0x1c6   :  { %2701 = vmatprep.subr.bf16.mxu0 %v1603_v51 }
 0x1c7   :  { %2722 = vmatpush3.bf16.msra.mxu1 %v1610_v18 }
 0x1c8   :  { %2723 = vmatprep.subr.bf16.mxu1 %v1619_v28 }
 0x1c9   :  { %2702 = vmatpush3.bf16.msra.mxu0 %v1595_v11 }
 0x1ca   :  { %2760 = vmatprep.subr.bf16.mxu0 %v2998_v7 }
 0x1cb   :  { %2724 = vmatpush3.bf16.msra.mxu1 %v1611_v29 }
 0x1cc   :  { %1733 = vmatmul.mubr.bf16.vlgmr.msra.gmra.mrb[20].mxu0 %v1552_v31 }
 0x1cd   :  { %2761 = vmatpush3.bf16.msra.mxu0 %v2910_v15  ;;  %2776 = vmatprep.mubr.msk.bf16.mxu0 %vm2999_vm1, %v2998_v7 }
 0x1ce   :  { %1773 = vmatmul.mubr.bf16.vlgmr.msra.gmra.mrb[20].mxu1 %v1554_v38  ;;  %2762 = vmatprep.subr.bf16.mxu0 %v2998_v7 }
 0x1d1   :  { %2763 = vmatpush3.bf16.msra.mxu0 %v2911_v49 }
 0x1d2   :  { %2764 = vmatprep.subr.bf16.mxu0 %v2998_v7 }
 0x1d5   :  { %2765 = vmatpush3.bf16.msra.mxu0 %v2912_v12 }
 0x1d6   :  { %2766 = vmatprep.subr.bf16.mxu0 %v2998_v7 }
 0x1d9   :  { %2767 = vmatpush3.bf16.msra.mxu0 %v2913_v17 }
 0x1da   :  { %2768 = vmatprep.subr.bf16.mxu0 %v2998_v7 }
 0x1dd   :  { %2769 = vmatpush3.bf16.msra.mxu0 %v2914_v26 }
 0x1de   :  { %2770 = vmatprep.subr.bf16.mxu0 %v2998_v7 }
 0x1e1   :  { %2771 = vmatpush3.bf16.msra.mxu0 %v2915_v25  ;;  %v3860_v25 = vld [vmem:[#allocation23_spill] sm:$0xff] }
 0x1e2   :  { %2772 = vmatprep.subr.bf16.mxu0 %v2998_v7 }
 0x1e5   :  { %2773 = vmatpush3.bf16.msra.mxu0 %v2916_v55 }
 0x1e6   :  { %2774 = vmatprep.subr.bf16.mxu0 %v2998_v7 }
 0x1e9   :  { %2775 = vmatpush3.bf16.msra.mxu0 %v2917_v24 }
 0x1ff   :  { %v2483_v57 = vpop.f32.mrb[0].mxu0 }
 0x200   :  { %v2484_v46 = vpop.f32.mrb[1].mxu0 }
 0x201   :  { %v2505_v23 = vpop.f32.mrb[0].mxu1  ;;  %v2485_v30 = vadd.f32 %v2484_v46, %v2483_v57  ;;  %v2486_v43 = vpop.f32.mrb[2].mxu0 }
 0x202   :  { %v2506_v54 = vpop.f32.mrb[1].mxu1  ;;  %v2487_v58 = vpop.f32.mrb[3].mxu0 }
 0x203   :  { %v2507_v41 = vadd.f32 %v2506_v54, %v2505_v23  ;;  %v2508_v36 = vpop.f32.mrb[2].mxu1 }
 0x204   :  { %v2509_v20 = vpop.f32.mrb[3].mxu1 }
 0x205   :  { %v1295_v10 = vadd.f32 %v2507_v41, %v2485_v30 }
 0x21f   :  { %v2527_v14 = vpop.f32.mrb[4].mxu0 }
 0x220   :  { %v2528_v21 = vpop.f32.mrb[5].mxu0 }
 0x221   :  { %v2549_v35 = vpop.f32.mrb[4].mxu1  ;;  %v2529_v8 = vadd.f32 %v2528_v21, %v2527_v14  ;;  %v2530_v44 = vpop.f32.mrb[6].mxu0 }
 0x222   :  { %v2550_v6 = vpop.f32.mrb[5].mxu1  ;;  %v2531_v39 = vpop.f32.mrb[7].mxu0 }
 0x223   :  { %v2551_v45 = vadd.f32 %v2550_v6, %v2549_v35  ;;  %v2552_v32 = vpop.f32.mrb[6].mxu1  ;;  %v1335_v48 = vadd.f32 %v2529_v8, %v1295_v10 }
 0x224   :  { %v2553_v63 = vpop.f32.mrb[7].mxu1 }
 0x225   :  { %v1375_v13 = vadd.f32 %v2551_v45, %v1335_v48  ;;  %v3859_v45 = vld [vmem:[#allocation22_spill] sm:$0xff] }
 0x23f   :  { %v2571_v9 = vpop.f32.mrb[8].mxu0 }
 0x240   :  { %v2572_v37 = vpop.f32.mrb[9].mxu0 }
 0x241   :  { %v2593_v22 = vpop.f32.mrb[8].mxu1  ;;  %v2573_v52 = vadd.f32 %v2572_v37, %v2571_v9  ;;  %v2574_v34 = vpop.f32.mrb[10].mxu0 }
 0x242   :  { %v2594_v59 = vpop.f32.mrb[9].mxu1  ;;  %v2575_v53 = vpop.f32.mrb[11].mxu0 }
 0x243   :  { %v2595_v33 = vadd.f32 %v2594_v59, %v2593_v22  ;;  %v2596_v47 = vpop.f32.mrb[10].mxu1  ;;  %v1415_v60 = vadd.f32 %v2573_v52, %v1375_v13 }
 0x244   :  { %v2597_v56 = vpop.f32.mrb[11].mxu1 }
 0x245   :  { %v1455_v61 = vadd.f32 %v2595_v33, %v1415_v60 }
 0x25f   :  { %v2615_v62 = vpop.f32.mrb[12].mxu0 }
 0x260   :  { %v2616_v40 = vpop.f32.mrb[13].mxu0 }
 0x261   :  { %v2637_v0 = vpop.f32.mrb[12].mxu1  ;;  %v2617_v1 = vadd.f32 %v2616_v40, %v2615_v62  ;;  %v2618_v4 = vpop.f32.mrb[14].mxu0 }
 0x262   :  { %v2638_v42 = vpop.f32.mrb[13].mxu1  ;;  %v2619_v16 = vpop.f32.mrb[15].mxu0 }
 0x263   :  { %v2639_v3 = vadd.f32 %v2638_v42, %v2637_v0  ;;  %v2640_v5 = vpop.f32.mrb[14].mxu1  ;;  %v1495_v51 = vadd.f32 %v2617_v1, %v1455_v61 }
 0x264   :  { %v2641_v18 = vpop.f32.mrb[15].mxu1 }
 0x265   :  { %v1535_v28 = vadd.f32 %v2639_v3, %v1495_v51 }
 0x27f   :  { %v2659_v2 = vpop.f32.mrb[16].mxu0 }
 0x280   :  { %v2660_v27 = vpop.f32.mrb[17].mxu0 }
 0x281   :  { %v2681_v19 = vpop.f32.mrb[16].mxu1  ;;  %v2661_v11 = vadd.f32 %v2660_v27, %v2659_v2  ;;  %v2662_v31 = vpop.f32.mrb[18].mxu0 }
 0x282   :  { %v2682_v50 = vpop.f32.mrb[17].mxu1  ;;  %v2663_v57 = vpop.f32.mrb[19].mxu0 }
 0x283   :  { %v2683_v29 = vadd.f32 %v2682_v50, %v2681_v19  ;;  %v2684_v38 = vpop.f32.mrb[18].mxu1 }
 0x284   :  { %v2685_v23 = vpop.f32.mrb[19].mxu1 }
 0x285   :  { %v1695_v46 = vadd.f32 %v2683_v29, %v2661_v11 }
 0x29f   :  { %v2703_v54 = vpop.f32.mrb[20].mxu0 }
 0x2a0   :  { %v2704_v41 = vpop.f32.mrb[21].mxu0 }
 0x2a1   :  { %v2725_v30 = vpop.f32.mrb[20].mxu1  ;;  %v2705_v36 = vadd.f32 %v2704_v41, %v2703_v54  ;;  %v2706_v20 = vpop.f32.mrb[22].mxu0 }
 0x2a2   :  { %v2726_v43 = vpop.f32.mrb[21].mxu1  ;;  %v2707_v14 = vpop.f32.mrb[23].mxu0 }
 0x2a3   :  { %v2727_v58 = vadd.f32 %v2726_v43, %v2725_v30  ;;  %v2728_v10 = vpop.f32.mrb[22].mxu1  ;;  %v1735_v21 = vadd.f32 %v2705_v36, %v1695_v46 }
 0x2a4   :  { %v2729_v35 = vpop.f32.mrb[23].mxu1 }
 0x2a5   :  { %v1775_v6 = vadd.f32 %v2727_v58, %v1735_v21 }
 0x2a7   :  { %v1780_v8 = vadd.f32 %v1775_v6, %v1535_v28 }
 0x2a9   :  { %v1785_v44 = vadd.f32 %v3859_v45, %v1780_v8 }
 0x2ab   :  { %v1786_v32 = vmul.f32 %v1785_v44, %v1785_v44 }
 0x2ad   :  { %v1787_v39 = vmul.f32 %v1786_v32, %v1785_v44 }
 0x2af   :  { %v1788_v63 = vmul.f32 0.044715, %v1787_v39 }
 0x2b1   :  { %v1789_v48 = vadd.f32 %v1788_v63, %v1785_v44 }
 0x2b3   :  { %v1790_v13 = vmul.f32 0.7978846, %v1789_v48 }
 0x2b5   :  { %2918 = vtanh.f32 %v1790_v13 }
 0x2bf   :  { %v2919_v15 = vpop.eup %2918 }
 0x2c0   :  { %v1792_v7 = vadd.f32 1.0, %v2919_v15 }
 0x2c2   :  { %v1793_v49 = vmul.f32 0.5, %v1792_v7 }
 0x2c4   :  { %v1794_v12 = vmul.f32 %v1793_v49, %v1785_v44 }
 0x2c6   :  { %v1795_v17 = vpack.c.bf16 %v1794_v12, %v1794_v12 }
 0x2c8   :  { %2777 = vmatmul.mubr.bf16.vlgmr.msra.gmra.mrb[24].mxu0 %v1795_v17 }
 0x39b   :  { %v1898_v26 = vpop.f32.mrb[24].mxu0 }
 0x39c   :  { %v3680_v55 = vadd.f32 %v3860_v25, %v1898_v26  ;;  %v2778_v9 = vpop.f32.mrb[25].mxu0 }
 0x39d   :  { %v1901_v22 = vpop.f32.mrb[26].mxu0 }
 0x39e   :  { %v2779_v37 = vpop.f32.mrb[27].mxu0 }
 0x39f   :  { %2988 = dma.done.wait [#allocation4 + $0x1], 4096 }
 0x3a0   :  { %2989 = vsyncadd [#allocation4 + $0x1], 4294963200  ;;  %v3861_v59 = vmov 0   ;;  %v1910_v52 = vld [vmem:[#allocation3 + $0x8] sm:$0xff]  ;;  %v1912_v33 = vld [vmem:[#allocation3 + $0x18] sm:$0xff]  ;;  %v1908_v58 = vpack.c.bf16 %v3680_v55, %v3680_v55  ;;  %vm2129_vm2 = vcmask 261120  }
 0x3a1   :  { %1994 = vmatprep.mubr.bf16.mxu1 %v3861_v59  ;;  %2035 = vmatprep.mubr.bf16.mxu0 %v3861_v59  ;;  %v1909_v34 = vld [vmem:[#allocation3] sm:$0xff]  ;;  %v1911_v47 = vld [vmem:[#allocation3 + $0x10] sm:$0xff]  ;;  %v1914_v24 = vld [vmem:[#allocation3 + $0x28] sm:$0xff]  ;;  %vm2356_vm3 = vcmask 523264  }
 0x3a2   :  { %1962 = vmatprep.subr.bf16.mxu1 %v1910_v52  ;;  %2003 = vmatprep.subr.bf16.mxu0 %v1912_v33  ;;  %v1916_v53 = vld [vmem:[#allocation3 + $0x38] sm:$0xff]  ;;  %v1913_v56 = vld [vmem:[#allocation3 + $0x20] sm:$0xff]  ;;  %v1915_v60 = vld [vmem:[#allocation3 + $0x30] sm:$0xff] }
 0x3a3   :  { %1963 = vmatpush1.bf16.msra.mxu1 %v1909_v34  ;;  %2004 = vmatpush1.bf16.msra.mxu0 %v1911_v47  ;;  %v1918_v61 = vld [vmem:[#allocation3 + $0x48] sm:$0xff]  ;;  %v1920_v62 = vld [vmem:[#allocation3 + $0x58] sm:$0xff]  ;;  %v1917_v0 = vld [vmem:[#allocation3 + $0x40] sm:$0xff] }
 0x3a4   :  { %1964 = vmatprep.subr.bf16.mxu1 %v1914_v24  ;;  %2005 = vmatprep.subr.bf16.mxu0 %v1916_v53  ;;  %v1919_v40 = vld [vmem:[#allocation3 + $0x50] sm:$0xff]  ;;  %v1922_v42 = vld [vmem:[#allocation3 + $0x68] sm:$0xff]  ;;  %v1924_v1 = vld [vmem:[#allocation3 + $0x78] sm:$0xff] }
 0x3a5   :  { %v1921_v3 = vld [vmem:[#allocation3 + $0x60] sm:$0xff]  ;;  %v1923_v4 = vld [vmem:[#allocation3 + $0x70] sm:$0xff]  ;;  %v1926_v5 = vld [vmem:[#allocation3 + $0x88] sm:$0xff] }
 0x3a6   :  { %v1928_v16 = vld [vmem:[#allocation3 + $0x98] sm:$0xff]  ;;  %v1925_v18 = vld [vmem:[#allocation3 + $0x80] sm:$0xff]  ;;  %v1927_v51 = vld [vmem:[#allocation3 + $0x90] sm:$0xff] }
 0x3a7   :  { %1965 = vmatpush1.bf16.msra.mxu1 %v1913_v56  ;;  %2006 = vmatpush1.bf16.msra.mxu0 %v1915_v60  ;;  %v1930_v28 = vld [vmem:[#allocation3 + $0xa8] sm:$0xff]  ;;  %v1932_v2 = vld [vmem:[#allocation3 + $0xb8] sm:$0xff]  ;;  %v1929_v19 = vld [vmem:[#allocation3 + $0xa0] sm:$0xff] }
 0x3a8   :  { %1966 = vmatprep.subr.bf16.mxu1 %v1918_v61  ;;  %2007 = vmatprep.subr.bf16.mxu0 %v1920_v62  ;;  %v1931_v27 = vld [vmem:[#allocation3 + $0xb0] sm:$0xff]  ;;  %v1934_v50 = vld [vmem:[#allocation3 + $0xc8] sm:$0xff]  ;;  %v1936_v11 = vld [vmem:[#allocation3 + $0xd8] sm:$0xff] }
 0x3a9   :  { %v1933_v29 = vld [vmem:[#allocation3 + $0xc0] sm:$0xff]  ;;  %v1935_v31 = vld [vmem:[#allocation3 + $0xd0] sm:$0xff]  ;;  %v1938_v38 = vld [vmem:[#allocation3 + $0xe8] sm:$0xff] }
 0x3aa   :  { %v1940_v57 = vld [vmem:[#allocation3 + $0xf8] sm:$0xff]  ;;  %v2125_v23 = vld [vmem:[%s3822_s8 + $0x40] sm:$0xff]  ;;  %v2126_v46 = vld [vmem:[%s3822_s8 + $0x48] sm:$0xff] }
 0x3ab   :  { %1967 = vmatpush1.bf16.msra.mxu1 %v1917_v0  ;;  %2008 = vmatpush1.bf16.msra.mxu0 %v1919_v40  ;;  %v1937_v54 = vld [vmem:[#allocation3 + $0xe0] sm:$0xff]  ;;  %v1939_v30 = vld [vmem:[#allocation3 + $0xf0] sm:$0xff]  ;;  %v2814_v41 = vpack.c.bf16 %v2126_v46, %v2125_v23  ;;  %v2128_v36 = vld [vmem:[%s3822_s8 + $0x58] sm:$0xff] }
 0x3ac   :  { %1968 = vmatprep.subr.bf16.mxu1 %v1922_v42  ;;  %2009 = vmatprep.subr.bf16.mxu0 %v1924_v1  ;;  %v2127_v43 = vld [vmem:[%s3822_s8 + $0x50] sm:$0xff]  ;;  %v3862_v10 = vld [vmem:[#allocation18_spill] sm:$0xff]  ;;  %v3863_v14 = vld [vmem:[#allocation19_spill] sm:$0xff] }
 0x3ad   :  { %v2818_v20 = vpack.c.bf16 %v2128_v36, %v2127_v43  ;;  %v3864_v35 = vld [vmem:[#allocation20_spill] sm:$0xff]  ;;  %v3865_v21 = vld [vmem:[#allocation21_spill] sm:$0xff]  ;;  %v2117_v6 = vld [vmem:[%s3822_s8] sm:$0xff] }
 0x3ae   :  { %v3866_v8 = vld [vmem:[#allocation27_spill] sm:$0xff]  ;;  %v3867_v44 = vld [vmem:[#allocation28_spill] sm:$0xff]  ;;  %v3868_v32 = vld [vmem:[#allocation26_spill] sm:$0xff] }
 0x3af   :  { %1969 = vmatpush1.bf16.msra.mxu1 %v1921_v3  ;;  %2010 = vmatpush1.bf16.msra.mxu0 %v1923_v4  ;;  %v1956_v45 = vsub.s32 3, %v3866_v8  ;;  %v1945_v39 = vrot.slane %v3868_v32, %v3867_v44  ;;  %v3869_v63 = vld [vmem:[#allocation30_spill] sm:$0xff]  ;;  %v3870_v15 = vld [vmem:[#allocation29_spill] sm:$0xff]  ;;  %v2118_v42 = vld [vmem:[%s3822_s8 + $0x8] sm:$0xff] }
 0x3b0   :  { %1970 = vmatprep.subr.bf16.mxu1 %v1926_v5  ;;  %2011 = vmatprep.subr.bf16.mxu0 %v1928_v16  ;;  %v1953_v48 = vrot.slane %v3868_v32, %v3869_v63  ;;  %v1949_v7 = vrot.slane %v3868_v32, %v3870_v15  ;;  %v2119_v1 = vld [vmem:[%s3822_s8 + $0x10] sm:$0xff]  ;;  %v2120_v3 = vld [vmem:[%s3822_s8 + $0x18] sm:$0xff]  ;;  %v2121_v4 = vld [vmem:[%s3822_s8 + $0x20] sm:$0xff] }
 0x3b1   :  { %v1957_v13 = vrot.slane %v3868_v32, %v1956_v45  ;;  %v2122_v5 = vld [vmem:[%s3822_s8 + $0x28] sm:$0xff]  ;;  %v2123_v16 = vld [vmem:[%s3822_s8 + $0x30] sm:$0xff] }
 0x3b3   :  { %1971 = vmatpush1.bf16.msra.mxu1 %v1925_v18  ;;  %2012 = vmatpush1.bf16.msra.mxu0 %v1927_v51  ;;  %v2124_v18 = vld [vmem:[%s3822_s8 + $0x38] sm:$0xff]  ;;  %s3000_s8 = smov [#allocation8]  }
 0x3b4   :  { %1972 = vmatprep.subr.bf16.mxu1 %v1930_v28  ;;  %2013 = vmatprep.subr.bf16.mxu0 %v1932_v2  ;;  %s2372_s3 = sshll.u32 %s3000_s8, 4  ;;  %s2373_s3 = int_to_ptr.vmem [resolvable:$true] %s2372_s3 }
 0x3b5   :  { %s2962_s20 = scalar_lea.vmem %s2373_s3, 1024  ;;  %p2967_p0 = scmp.lt.s32.totalorder %s2373_s3, %s2373_s3 }
 0x3b6   :  { %p2963_p13 = scmp.ne.s32.totalorder %s2373_s3, %s2962_s20  ;;  %p2968_p1 = scmp.lt.s32.totalorder %s2962_s20, %s2962_s20 }
 0x3b7   :  { %1973 = vmatpush1.bf16.msra.mxu1 %v1929_v19  ;;  %2014 = vmatpush1.bf16.msra.mxu0 %v1931_v27 }
 0x3b8   :  { %1974 = vmatprep.subr.bf16.mxu1 %v1934_v50  ;;  %2015 = vmatprep.subr.bf16.mxu0 %v1936_v11  ;;  %p2969_p2 = por %p2968_p1, %p2967_p0 }
 0x3ba   :  { %p2970_p3 = pnand %p2969_p2, %p2963_p13 }
 0x3bb   :  { %1975 = vmatpush1.bf16.msra.mxu1 %v1933_v29  ;;  %2016 = vmatpush1.bf16.msra.mxu0 %v1935_v31 }
 0x3bc   :  { %1976 = vmatprep.subr.bf16.mxu1 %v1938_v38  ;;  %2017 = vmatprep.subr.bf16.mxu0 %v1940_v57 }
 0x3bf   :  { %1977 = vmatpush1.bf16.msra.mxu1 %v1937_v54  ;;  %2018 = vmatpush1.bf16.msra.mxu0 %v1939_v30 }
 0x3c0   :  { %2815 = vmatprep.subr.bf16.mxu1 %v2814_v41 }
 0x3c2   :  { %1995 = vmatmul.mubr.bf16.vlgmr.msra.gmra.mrb[24].mxu1 %v1908_v58  ;;  %2036 = vmatmul.mubr.bf16.vlgmr.msra.gmra.mrb[28].mxu0 %v1908_v58 }
 0x3c3   :  { %2817 = vmatpush3.bf16.msra.mxu1 %v2814_v41  ;;  %2788 = vmatprep.mubr.msk.f32.mxu1 %vm2129_vm2, %v3862_v10 }
 0x3c4   :  { %2819 = vmatprep.subr.bf16.mxu1 %v2818_v20 }
 0x3c7   :  { %2821 = vmatpush3.bf16.msra.mxu1 %v2818_v20 }
 0x3ca   :  { %2789 = vmatmul.mubr.msk.f32.vlgmr.msra.gmra.mrb[28].mxu1 %vm2129_vm2, %v3863_v14 }
 0x3cb   :  { %2791 = vmatprep.mubr.msk.f32.mxu1 %vm2129_vm2, %v3864_v35 }
 0x3ce   :  { %2792 = vmatmul.mubr.msk.f32.gmra.mrb[30].mxu1 %vm2129_vm2, %v3865_v21 }
 0x3cf   :  { %2802 = vmatprep.mubr.msk.f32.mxu1 %vm2129_vm2, %v2117_v6 }
 0x495   :  { %v1996_v49 = vpop.f32.mrb[24].mxu1  ;;  %v2037_v12 = vpop.f32.mrb[28].mxu0 }
 0x496   :  { %v1997_v17 = vadd.f32 %v1996_v49, %v1945_v39  ;;  %v2038_v26 = vadd.f32 %v2037_v12, %v1953_v48  ;;  %v1998_v25 = vpop.f32.mrb[25].mxu1  ;;  %v2039_v55 = vpop.f32.mrb[29].mxu0 }
 0x497   :  { %v2000_v9 = vpop.f32.mrb[26].mxu1  ;;  %v2040_v22 = vadd.f32 %v2039_v55, %v1957_v13  ;;  %v2041_v37 = vpop.f32.mrb[30].mxu0  ;;  %v1999_v59 = vadd.f32 %v1998_v25, %v1949_v7 }
 0x498   :  { %v2001_v52 = vpop.f32.mrb[27].mxu1  ;;  %v2042_v33 = vpop.f32.mrb[31].mxu0  ;;  %v2085_v34 = vsel %vm897_vm0, %v2038_v26, 0.0  ;;  %v2044_v47 = vsel %vm897_vm0, %v1997_v17, 0.0 }
 0x499   :  { %2086 = vadd.xlane.f32.xlu1 %v2085_v34  ;;  %2045 = vadd.xlane.f32.xlu0 %v2044_v47  ;;  %v2101_v24 = vsel %vm897_vm0, %v2040_v22, 0.0  ;;  %v2069_v53 = vsel %vm897_vm0, %v1999_v59, 0.0 }
 0x49d   :  { %2102 = vadd.xlane.f32.xlu1 %v2101_v24  ;;  %2070 = vadd.xlane.f32.xlu0 %v2069_v53  ;;  %v2790_v56 = vpop.f32.mrb[28].mxu1 }
 0x49e   :  { %v2208_v60 = vpop.f32.mrb[29].mxu1 }
 0x49f   :  { %v2822_v61 = vpack.c.bf16 %v2790_v56, %v2208_v60 }
 0x4a1   :  { %v2793_v62 = vpop.f32.mrb[30].mxu1  ;;  %2823 = vmatprep.subr.bf16.mxu1 %v2822_v61 }
 0x4a2   :  { %v2218_v0 = vpop.f32.mrb[31].mxu1  ;;  %2825 = vmatpush3.bf16.msra.mxu1 %v2822_v61 }
 0x4a3   :  { %v2826_v40 = vpack.c.bf16 %v2793_v62, %v2218_v0 }
 0x4a5   :  { %2827 = vmatprep.subr.bf16.mxu1 %v2826_v40 }
 0x4a6   :  { %2829 = vmatpush3.bf16.msra.mxu1 %v2826_v40 }
 0x4a9   :  { %2803 = vmatmul.mubr.msk.f32.vlgmr.msra.gmra.mrb[32].mxu1 %vm2129_vm2, %v2118_v42 }
 0x4aa   :  { %2805 = vmatprep.mubr.msk.f32.mxu1 %vm2129_vm2, %v2119_v1 }
 0x4ad   :  { %2806 = vmatmul.mubr.msk.f32.gmra.mrb[34].mxu1 %vm2129_vm2, %v2120_v3 }
 0x4ae   :  { %2808 = vmatprep.mubr.msk.f32.mxu1 %vm2129_vm2, %v2121_v4 }
 0x4b1   :  { %2809 = vmatmul.mubr.msk.f32.gmra.mrb[36].mxu1 %vm2129_vm2, %v2122_v5 }
 0x4b2   :  { %2811 = vmatprep.mubr.msk.f32.mxu1 %vm2129_vm2, %v2123_v16 }
 0x4b5   :  { %2812 = vmatmul.mubr.msk.f32.gmra.mrb[38].mxu1 %vm2129_vm2, %v2124_v18 }
 0x526   :  { %v2087_v51 = vpop.xlane.xlu1 %2086  ;;  %v2046_v28 = vpop.xlane.xlu0 %2045 }
 0x527   :  { %v2088_v2 = vmul.f32 0.0078125, %v2087_v51  ;;  %v2048_v19 = vmul.f32 0.0078125, %v2046_v28 }
 0x529   :  { %v3750_v27 = vsub.f32 %v2038_v26, %v2088_v2  ;;  %v3752_v50 = vsub.f32 %v1997_v17, %v2048_v19 }
 0x52a   :  { %v2103_v11 = vpop.xlane.xlu1 %2102  ;;  %v2071_v29 = vpop.xlane.xlu0 %2070 }
 0x52b   :  { %v2104_v31 = vmul.f32 0.0078125, %v2103_v11  ;;  %v2072_v38 = vmul.f32 0.0078125, %v2071_v29  ;;  %v2050_v57 = vmul.f32 %v3752_v50, %v3752_v50  ;;  %v2090_v30 = vmul.f32 %v3750_v27, %v3750_v27 }
 0x52d   :  { %v3756_v23 = vsub.f32 %v2040_v22, %v2104_v31  ;;  %v3758_v46 = vsub.f32 %v1999_v59, %v2072_v38  ;;  %v2051_v54 = vsel %vm897_vm0, %v2050_v57, 0.0  ;;  %v2091_v43 = vsel %vm897_vm0, %v2090_v30, 0.0 }
 0x52e   :  { %2052 = vadd.xlane.f32.xlu0 %v2051_v54 }
 0x52f   :  { %v2074_v41 = vmul.f32 %v3758_v46, %v3758_v46  ;;  %v2106_v58 = vmul.f32 %v3756_v23, %v3756_v23 }
 0x531   :  { %v2075_v36 = vsel %vm897_vm0, %v2074_v41, 0.0  ;;  %v2107_v20 = vsel %vm897_vm0, %v2106_v58, 0.0 }
 0x532   :  { %2092 = vadd.xlane.f32.xlu0 %v2091_v43  ;;  %2076 = vadd.xlane.f32.xlu1 %v2075_v36 }
 0x536   :  { %2108 = vadd.xlane.f32.xlu1 %v2107_v20 }
 0x57c   :  { %v2804_v10 = vpop.f32.mrb[32].mxu1 }
 0x57d   :  { %2358 = vst.msk [vmem:[#allocation8 + $0x8] sm:$0xff] %vm2356_vm3, %v2804_v10  ;;  %v2317_v14 = vpop.f32.mrb[33].mxu1 }
 0x57e   :  { %2357 = vst.msk [vmem:[#allocation8] sm:$0xff] %vm2356_vm3, %v2317_v14 }
 0x580   :  { %v2807_v35 = vpop.f32.mrb[34].mxu1 }
 0x581   :  { %2360 = vst.msk [vmem:[#allocation8 + $0x18] sm:$0xff] %vm2356_vm3, %v2807_v35  ;;  %v2327_v21 = vpop.f32.mrb[35].mxu1 }
 0x582   :  { %2359 = vst.msk [vmem:[#allocation8 + $0x10] sm:$0xff] %vm2356_vm3, %v2327_v21 }
 0x584   :  { %v2810_v6 = vpop.f32.mrb[36].mxu1 }
 0x585   :  { %2362 = vst.msk [vmem:[#allocation8 + $0x28] sm:$0xff] %vm2356_vm3, %v2810_v6  ;;  %v2337_v8 = vpop.f32.mrb[37].mxu1 }
 0x586   :  { %2361 = vst.msk [vmem:[#allocation8 + $0x20] sm:$0xff] %vm2356_vm3, %v2337_v8 }
 0x588   :  { %v2813_v45 = vpop.f32.mrb[38].mxu1 }
 0x589   :  { %2364 = vst.msk [vmem:[#allocation8 + $0x38] sm:$0xff] %vm2356_vm3, %v2813_v45  ;;  %v2347_v44 = vpop.f32.mrb[39].mxu1 }
 0x58a   :  { %2363 = vst.msk [vmem:[#allocation8 + $0x30] sm:$0xff] %vm2356_vm3, %v2347_v44 }
 0x58b   :  { %2973 = shalt.err (!%p2970_p3)
}
 0x58c   :  { %s2974_s5 = scalar_lea.hbm %s3824_s10, 1024 }
 0x58d   :  { %p2975_p4 = scmp.ne.s32.totalorder %s3824_s10, %s2974_s5  ;;  %p2978_p5 = scmp.lt.u32.totalorder %s2974_s5, %s3824_s10 }
 0x58f   :  { %p2980_p6 = pnand %p2978_p5, %p2975_p4 }
 0x591   :  { %2983 = shalt.err (!%p2980_p6)
}
 0x592   :  { %s3001_s26 = smov 128   ;;  %s3002_s27 = smov 8   ;;  %v3871_v22 = vld [vmem:[#allocation24_spill] sm:$0xff]  ;;  %v3872_v33 = vld [vmem:[#allocation25_spill] sm:$0xff] }
 0x593   :  { %2378 = dma.vmem_to_hbm [thread:$0]  %s2373_s3, 1024, %s3824_s10, [#allocation6], %s3001_s26, %s3001_s26, %s3002_s27  }
 0x5bb   :  { %v2053_v32 = vpop.xlane.xlu0 %2052 }
 0x5bc   :  { %v2054_v39 = vmul.f32 0.0078125, %v2053_v32 }
 0x5be   :  { %v2055_v63 = vadd.f32 1e-05, %v2054_v39 }
 0x5bf   :  { %v2077_v48 = vpop.xlane.xlu1 %2076  ;;  %v2093_v13 = vpop.xlane.xlu0 %2092 }
 0x5c0   :  { %2920 = vrsqrt.f32 %v2055_v63  ;;  %v2078_v15 = vmul.f32 0.0078125, %v2077_v48  ;;  %v2094_v7 = vmul.f32 0.0078125, %v2093_v13 }
 0x5c2   :  { %v2079_v49 = vadd.f32 1e-05, %v2078_v15  ;;  %v2095_v12 = vadd.f32 1e-05, %v2094_v7 }
 0x5c3   :  { %v2109_v17 = vpop.xlane.xlu1 %2108 }
 0x5c4   :  { %2922 = vrsqrt.f32 %v2079_v49  ;;  %v2110_v26 = vmul.f32 0.0078125, %v2109_v17 }
 0x5c5   :  { %2924 = vrsqrt.f32 %v2095_v12 }
 0x5c6   :  { %v2111_v25 = vadd.f32 1e-05, %v2110_v26 }
 0x5c8   :  { %2926 = vrsqrt.f32 %v2111_v25 }
 0x5ca   :  { %v2921_v55 = vpop.eup %2920 }
 0x5cb   :  { %v2057_v9 = vmul.f32 %v2921_v55, %v3752_v50 }
 0x5cd   :  { %v2062_v37 = vmul.f32 %v3871_v22, %v2057_v9 }
 0x5ce   :  { %v2923_v59 = vpop.eup %2922 }
 0x5cf   :  { %v2925_v52 = vpop.eup %2924  ;;  %v2067_v34 = vadd.f32 %v3872_v33, %v2062_v37  ;;  %v2081_v47 = vmul.f32 %v2923_v59, %v3758_v46 }
 0x5d0   :  { %v2097_v24 = vmul.f32 %v2925_v52, %v3750_v27 }
 0x5d1   :  { %2068 = vst [vmem:[%s3823_s9] sm:$0x1f] %v2067_v34  ;;  %v2082_v53 = vmul.f32 %v3871_v22, %v2081_v47 }
 0x5d2   :  { %v2927_v56 = vpop.eup %2926  ;;  %v2098_v60 = vmul.f32 %v3871_v22, %v2097_v24 }
 0x5d3   :  { %v2083_v61 = vadd.f32 %v3872_v33, %v2082_v53  ;;  %v2113_v62 = vmul.f32 %v2927_v56, %v3756_v23 }
 0x5d4   :  { %v2099_v0 = vadd.f32 %v3872_v33, %v2098_v60 }
 0x5d5   :  { %2084 = vst [vmem:[%s3823_s9 + $0x8] sm:$0x1f] %v2083_v61  ;;  %v2114_v40 = vmul.f32 %v3871_v22, %v2113_v62 }
 0x5d6   :  { %2100 = vst [vmem:[%s3823_s9 + $0x10] sm:$0x1f] %v2099_v0 }
 0x5d7   :  { %v2115_v42 = vadd.f32 %v3872_v33, %v2114_v40 }
 0x5d9   :  { %2116 = vst [vmem:[%s3823_s9 + $0x18] sm:$0x1f] %v2115_v42 }
 0x5da   :  { %2990 = dma.done.wait [#allocation6], 1024  }
 0x5db   :  { %2991 = vsyncadd [#allocation6], 4294966272 }
 0x5dc   :  { %2384 = vsyncpa [#allocation6], 1 }
 0x5dd   :  { %2385 = vsyncpa [#allocation7], 1 }
 0x5de   :  { %2386 = vsyncmov [#allocation4] }
 0x5e1   :  { %s2387_s24 = vpop.sfrf %2386 }
 0x5e2   :  { %p2465_p7 = scmp.ne.s32.totalorder %s2387_s24, 0 }
 0x5e4   :  { %2391 = shalt.err (%p2465_p7)  }
 0x5e5   :  { %2393 = vsyncmov [#allocation4 + $0x1] }
 0x5e8   :  { %s2394_s15 = vpop.sfrf %2393 }
 0x5e9   :  { %p2466_p8 = scmp.ne.s32.totalorder %s2394_s15, 0 }
 0x5eb   :  { %2398 = shalt.err (%p2466_p8)  }

</bundles_post_ra>
